<compile_context>
chip_gen: v7x
topology: tpu7x:2x2x1
jax: 0.10.0
libtpu: 0.0.40
codegen_flags: <defaults>
</compile_context>

<pallas_src>
import functools

import jax
import jax.numpy as jnp
from jax.experimental import pallas as pl
from jax.experimental.pallas import tpu as pltpu


# --------------------------------------------------------------------------------
# Fused kernel: grid = (phase, batch).
# Layout per batch: (C, Lp) with Lp = round_up(Hp*Wp, 128); row stride = Wp.
# --------------------------------------------------------------------------------
def _clnet_block_kernel(*refs, Wp, Lp, k1, k2, pool, shortcut, inv_cnt, eps):
    if shortcut:
        (xp_ref, w0_ref, wd1_ref, wd2_ref, w1_ref, wsc_ref, bsc_ref,
         gamma_ref, beta_ref, mask_ref, sel_ref,
         o_ref, y_store, ssum, ssq) = refs
    else:
        (xp_ref, w0_ref, wd1_ref, wd2_ref, w1_ref,
         gamma_ref, beta_ref, mask_ref, sel_ref,
         o_ref, y_store, ssum, ssq) = refs

    phase = pl.program_id(0)
    n = pl.program_id(1)

    @pl.when(jnp.logical_and(phase == 0, n == 0))
    def _init_stats():
        ssum[...] = jnp.zeros_like(ssum)
        ssq[...] = jnp.zeros_like(ssq)

    @pl.when(phase == 0)
    def _compute():
        xp = xp_ref[0]                                               # (Cin, Lp) bf16
        # pconv0: grouped 1x1 conv expanded to block-diagonal dense matmul (MXU).
        x1 = jnp.dot(w0_ref[...], xp, preferred_element_type=jnp.float32)

        # Depthwise convs, factored: shared column rolls, per-row VPU weighted
        # sums, then one row roll per row offset (10 XLU rolls for (3,5) instead
        # of 32). Circular rolls are exact for interior pixels: with the single
        # max-halo padding no interior tap ever wraps (halo of x1 is exactly 0
        # because pconv0 has no bias).
        r1, r2 = (k1 - 1) // 2, (k2 - 1) // 2
        rmax = max(r1, r2)
        col = {0: x1}
        for dc in range(1, rmax + 1):
            col[dc] = pltpu.roll(x1, shift=(Lp - dc) % Lp, axis=1)    # x1[p + dc]
            col[-dc] = pltpu.roll(x1, shift=dc, axis=1)               # x1[p - dc]

        def dconv(wd_ref, k, r):
            out = None
            for i in range(k):
                dr = i - r
                rowsum = None
                for j in range(k):
                    term = col[j - r] * wd_ref[i * k + j]             # (Cin,1) bcast
                    rowsum = term if rowsum is None else rowsum + term
                if dr != 0:
                    rowsum = pltpu.roll(rowsum, shift=(-dr * Wp) % Lp, axis=1)
                out = rowsum if out is None else out + rowsum
            return out

        o1 = dconv(wd1_ref, k1, r1)
        o2 = dconv(wd2_ref, k2, r2)
        # TODO(synk): cast the dwconv/gate elementwise math to bf16 on v6e/v7x.
        gated = o2 * jax.nn.sigmoid(o1) + o1 * jax.nn.sigmoid(o2)     # (Cin, Lp) f32

        # pconv1 (MXU); y stays resident in VMEM scratch for phase 1.
        y = jnp.dot(w1_ref[...], gated.astype(jnp.bfloat16),
                    preferred_element_type=jnp.float32)               # (Cout, Lp)
        y_store[n] = y

        # BN partial stats over interior pixels as MXU reductions (mask column).
        # NOTE: E[x^2]-E[x]^2 in f32 is cancellation-prone when |mean| >> std.
        m = mask_ref[...]                                             # (Lp, 1)
        ssum[...] += jnp.dot(y, m, preferred_element_type=jnp.float32)
        ssq[...] += jnp.dot(y * y, m, preferred_element_type=jnp.float32)

        # Keep the phase-0 writeback of this output block well defined
        # (fully overwritten by phase 1).
        o_ref[...] = jnp.zeros_like(o_ref)

    @pl.when(phase == 1)
    def _finalize():
        # Training-mode BatchNorm from the accumulated batch statistics.
        mean = ssum[...] * inv_cnt                                    # (Cout, 1)
        var = jnp.maximum(ssq[...] * inv_cnt - mean * mean, 0.0)
        scale = gamma_ref[...] * jax.lax.rsqrt(var + eps)
        bias = beta_ref[...] - mean * scale

        z = y_store[n] * scale + bias                                 # (Cout, Lp)
        if shortcut:
            # Recompute the 1x1 shortcut here (MXU is idle in this phase) instead
            # of round-tripping a (Cout, Lp) buffer through HBM.
            z = z + (jnp.dot(wsc_ref[...], xp_ref[0],
                             preferred_element_type=jnp.float32) + bsc_ref[...])
        if pool:
            # 2x2 maxpool: pairwise max with right / down neighbours; the
            # selection below picks the top-left corner of each 2x2 window.
            z = jnp.maximum(z, pltpu.roll(z, shift=(Lp - 1) % Lp, axis=1))
            z = jnp.maximum(z, pltpu.roll(z, shift=(Lp - Wp) % Lp, axis=1))
        # Interior / pooled extraction as a 0/1 selection matmul; OszP is a
        # multiple of 128 so the store is a full-lane unmasked vst.
        o_ref[0] = jnp.dot(z, sel_ref[...], preferred_element_type=jnp.float32)


# --------------------------------------------------------------------------------
# Parameter setup (PyTorch-shaped, converted to kernel layouts).
# --------------------------------------------------------------------------------
def _grouped_1x1_to_dense(w, in_ch, out_ch, groups):
    """PyTorch grouped 1x1 weight (out_ch, in_ch//groups) -> dense (out_ch, in_ch)."""
    # TODO(synk): at production channel counts keep the grouped 1x1 convs grouped
    # (group grid axis / in-kernel loop) instead of this 2x-MAC dense expansion.
    in_per = in_ch // groups
    out_per = out_ch // groups
    dense = jnp.zeros((out_ch, in_ch), jnp.float32)
    for g in range(groups):
        dense = dense.at[g * out_per:(g + 1) * out_per,
                         g * in_per:(g + 1) * in_per].set(
                             w[g * out_per:(g + 1) * out_per, :])
    return dense


def init_params(key, in_ch, out_ch, kernel_size, pgroup):
    k1, k2 = kernel_size
    ks = jax.random.split(key, 8)
    w_pconv0 = 0.2 * jax.random.normal(ks[0], (in_ch, in_ch // pgroup), jnp.float32)
    w_dconv1 = 0.2 * jax.random.normal(ks[1], (in_ch, k1, k1), jnp.float32)
    w_dconv2 = 0.2 * jax.random.normal(ks[2], (in_ch, k2, k2), jnp.float32)
    w_pconv1 = 0.2 * jax.random.normal(ks[3], (out_ch, in_ch // pgroup), jnp.float32)
    w_psc = 0.2 * jax.random.normal(ks[4], (out_ch, in_ch), jnp.float32)
    b_psc = 0.05 * jax.random.normal(ks[5], (out_ch,), jnp.float32)
    gamma = 1.0 + 0.1 * jax.random.normal(ks[6], (out_ch,), jnp.float32)
    beta = 0.1 * jax.random.normal(ks[7], (out_ch,), jnp.float32)
    return {
        # MXU operands stored in bf16 (accumulation is f32 inside the kernel).
        "w0": _grouped_1x1_to_dense(w_pconv0, in_ch, in_ch, pgroup).astype(jnp.bfloat16),
        "w1": _grouped_1x1_to_dense(w_pconv1, in_ch, out_ch, pgroup).astype(jnp.bfloat16),
        "wsc": w_psc.astype(jnp.bfloat16),
        "bsc": b_psc.reshape(out_ch, 1),
        # depthwise weights as (k*k, C, 1): per-tap per-channel coefficients (f32).
        "wd1": jnp.transpose(w_dconv1.reshape(in_ch, k1 * k1)).reshape(k1 * k1, in_ch, 1),
        "wd2": jnp.transpose(w_dconv2.reshape(in_ch, k2 * k2)).reshape(k2 * k2, in_ch, 1),
        "gamma": gamma.reshape(out_ch, 1),
        "beta": beta.reshape(out_ch, 1),
    }


# --------------------------------------------------------------------------------
# Full forward, matching the PyTorch module (NCHW in / NCHW out).
# --------------------------------------------------------------------------------
def sparse_cross_link_block(x_nchw, params, *, kernel_size, pool_enable,
                            shortcut_enable):
    k1, k2 = kernel_size
    N, Cin, H, W = x_nchw.shape
    Cout = params["w1"].shape[0]

    # Single max-halo spatial padding; the flattened buffer is tail-padded to a
    # multiple of 128 lanes while the row stride stays Wp = W + 2P.
    P = max((k1 - 1) // 2, (k2 - 1) // 2)
    Hp, Wp = H + 2 * P, W + 2 * P
    HpWp = Hp * Wp
    Lp = ((HpWp + 127) // 128) * 128

    xp = jnp.pad(x_nchw.astype(jnp.float32),
                 ((0, 0), (0, 0), (P, P), (P, P))).reshape(N, Cin, HpWp)
    xp = jnp.pad(xp, ((0, 0), (0, 0), (0, Lp - HpWp))).astype(jnp.bfloat16)

    # Interior (non-halo, non-tail) mask column for the MXU BN reductions.
    flat = jnp.arange(Lp)
    row, colm = flat // Wp, flat % Wp
    interior = ((flat < HpWp) & (row >= P) & (row < P + H)
                & (colm >= P) & (colm < P + W))
    mask_col = interior.astype(jnp.float32)[:, None]                  # (Lp, 1)

    # Selection matrix: padded-flat index -> (pooled) interior pixel, zero-padded
    # to a lane-dense output width (multiple of 128).
    if pool_enable:
        Ho, Wo = H // 2, W // 2
        q = jnp.arange(Ho * Wo)
        p_idx = (2 * (q // Wo) + P) * Wp + (2 * (q % Wo) + P)
    else:
        Ho, Wo = H, W
        q = jnp.arange(H * W)
        p_idx = ((q // W) + P) * Wp + ((q % W) + P)
    Osz = Ho * Wo
    OszP = ((Osz + 127) // 128) * 128
    sel = jnp.zeros((Lp, OszP), jnp.float32).at[p_idx, q].set(1.0)
    # TODO(synk): at large H*W replace the O(Lp*Osz) selection matmul with a
    # full-(Cout,Lp) slab output + XLA strided slice (sel alone outgrows VMEM).

    in_specs = [
        pl.BlockSpec((1, Cin, Lp), lambda p, n: (n, 0, 0)),
        pl.BlockSpec((Cin, Cin), lambda p, n: (0, 0)),
        pl.BlockSpec((k1 * k1, Cin, 1), lambda p, n: (0, 0, 0)),
        pl.BlockSpec((k2 * k2, Cin, 1), lambda p, n: (0, 0, 0)),
        pl.BlockSpec((Cout, Cin), lambda p, n: (0, 0)),
    ]
    operands = [xp, params["w0"], params["wd1"], params["wd2"], params["w1"]]
    if shortcut_enable:
        in_specs += [pl.BlockSpec((Cout, Cin), lambda p, n: (0, 0)),
                     pl.BlockSpec((Cout, 1), lambda p, n: (0, 0))]
        operands += [params["wsc"], params["bsc"]]
    in_specs += [pl.BlockSpec((Cout, 1), lambda p, n: (0, 0)),
                 pl.BlockSpec((Cout, 1), lambda p, n: (0, 0)),
                 pl.BlockSpec((Lp, 1), lambda p, n: (0, 0)),
                 pl.BlockSpec((Lp, OszP), lambda p, n: (0, 0))]
    operands += [params["gamma"], params["beta"], mask_col, sel]

    # Rough VMEM budget (double-buffered blocks + persistent scratch + live
    # intermediates), floored at the 32 MiB scoped default.
    est = (N * Cout * Lp * 4 + 2 * Cin * Lp * 2 + 2 * Cout * OszP * 4
           + Lp * (OszP + 1) * 4 + 12 * max(Cin, Cout) * Lp * 4)
    vmem_limit = int(min(max(2 * est, 32 * 1024 * 1024), 128 * 1024 * 1024))

    kern = functools.partial(_clnet_block_kernel, Wp=Wp, Lp=Lp, k1=k1, k2=k2,
                             pool=pool_enable, shortcut=shortcut_enable,
                             inv_cnt=1.0 / float(N * H * W), eps=1e-5)

    # Grid = (phase, batch): all batches must finish phase 0 (global BN batch
    # statistics) before phase 1, hence fully sequential 'arbitrary' semantics.
    out = pl.pallas_call(
        kern,
        out_shape=jax.ShapeDtypeStruct((N, Cout, OszP), jnp.float32),
        grid=(2, N),
        in_specs=in_specs,
        out_specs=pl.BlockSpec((1, Cout, OszP), lambda p, n: (n, 0, 0)),
        scratch_shapes=[pltpu.VMEM((N, Cout, Lp), jnp.float32),   # y (resident)
                        pltpu.VMEM((Cout, 1), jnp.float32),       # sum
                        pltpu.VMEM((Cout, 1), jnp.float32)],      # sum of squares
        compiler_params=pltpu.CompilerParams(
            dimension_semantics=("arbitrary", "arbitrary"),
            vmem_limit_bytes=vmem_limit),
    )(*operands)

    return out[:, :, :Osz].reshape(N, Cout, Ho, Wo)                  # NCHW


if __name__ == "__main__":
    N, Cin, H, W = 2, 8, 16, 16
    Cout = 16
    kernel_size = (3, 5)
    pgroup = 2
    pool_enable = True
    shortcut_enable = True

    key = jax.random.PRNGKey(0)
    kx, kp = jax.random.split(key)
    x_nchw = jax.random.normal(kx, (N, Cin, H, W), jnp.float32)
    params = init_params(kp, Cin, Cout, kernel_size, pgroup)

    out = sparse_cross_link_block(
        x_nchw, params,
        kernel_size=kernel_size,
        pool_enable=pool_enable,
        shortcut_enable=shortcut_enable)
    out = jax.block_until_ready(out)
    assert out.shape == (N, Cout, H // 2, W // 2), out.shape
    assert bool(jnp.all(jnp.isfinite(out))), "non-finite output"
    print("KERNEL_OK")
</pallas_src>

<mosaic_0001>
module attributes {stable_mosaic.version = 11 : i64} {
  func.func @_clnet_block_kernel(%arg0: i32, %arg1: i32, %arg2: memref<1x8x512xbf16, #tpu.memory_space<vmem>>, %arg3: memref<8x8xbf16, #tpu.memory_space<vmem>>, %arg4: memref<9x8x1xf32, #tpu.memory_space<vmem>>, %arg5: memref<25x8x1xf32, #tpu.memory_space<vmem>>, %arg6: memref<16x8xbf16, #tpu.memory_space<vmem>>, %arg7: memref<16x8xbf16, #tpu.memory_space<vmem>>, %arg8: memref<16x1xf32, #tpu.memory_space<vmem>>, %arg9: memref<16x1xf32, #tpu.memory_space<vmem>>, %arg10: memref<16x1xf32, #tpu.memory_space<vmem>>, %arg11: memref<512x1xf32, #tpu.memory_space<vmem>>, %arg12: memref<512x128xf32, #tpu.memory_space<vmem>>, %arg13: memref<1x16x128xf32, #tpu.memory_space<vmem>>, %arg14: memref<2x16x512xf32, #tpu.memory_space<vmem>>, %arg15: memref<16x1xf32, #tpu.memory_space<vmem>>, %arg16: memref<16x1xf32, #tpu.memory_space<vmem>>) attributes {dimension_semantics = [#tpu.dimension_semantics<arbitrary>, #tpu.dimension_semantics<arbitrary>], iteration_bounds = array<i64: 2, 2>, scalar_prefetch = 0 : i64, scratch_operands = 3 : i64, tpu.core_type = #tpu.core_type<tc>, window_params = [{transform_indices = @transform_0, window_bounds = array<i64: 1, 8, 512>}, {pipeline_mode = #tpu.pipeline_mode<synchronous>, transform_indices = @transform_1, window_bounds = array<i64: 8, 8>}, {pipeline_mode = #tpu.pipeline_mode<synchronous>, transform_indices = @transform_2, window_bounds = array<i64: 9, 8, 1>}, {pipeline_mode = #tpu.pipeline_mode<synchronous>, transform_indices = @transform_3, window_bounds = array<i64: 25, 8, 1>}, {pipeline_mode = #tpu.pipeline_mode<synchronous>, transform_indices = @transform_4, window_bounds = array<i64: 16, 8>}, {pipeline_mode = #tpu.pipeline_mode<synchronous>, transform_indices = @transform_5, window_bounds = array<i64: 16, 8>}, {pipeline_mode = #tpu.pipeline_mode<synchronous>, transform_indices = @transform_6, window_bounds = array<i64: 16, 1>}, {pipeline_mode = #tpu.pipeline_mode<synchronous>, transform_indices = @transform_7, window_bounds = array<i64: 16, 1>}, {pipeline_mode = #tpu.pipeline_mode<synchronous>, transform_indices = @transform_8, window_bounds = array<i64: 16, 1>}, {pipeline_mode = #tpu.pipeline_mode<synchronous>, transform_indices = @transform_9, window_bounds = array<i64: 512, 1>}, {pipeline_mode = #tpu.pipeline_mode<synchronous>, transform_indices = @transform_10, window_bounds = array<i64: 512, 128>}, {transform_indices = @transform_11, window_bounds = array<i64: 1, 16, 128>}]} {
    %c0_i32 = arith.constant 0 : i32
    %0 = arith.cmpi eq, %arg0, %c0_i32 : i32
    %c0_i32_0 = arith.constant 0 : i32
    %1 = arith.cmpi eq, %arg1, %c0_i32_0 : i32
    %2 = arith.andi %0, %1 : i1
    %3 = arith.extui %2 : i1 to i32
    %c0_i32_1 = arith.constant 0 : i32
    %4 = arith.cmpi ne, %3, %c0_i32_1 : i32
    scf.if %4 {
      %cst = arith.constant 0.000000e+00 : f32
      %11 = vector.broadcast %cst : f32 to vector<16x1xf32>
      %c0 = arith.constant 0 : index
      %c0_5 = arith.constant 0 : index
      %12 = vector.load %arg15[%c0, %c0_5] : memref<16x1xf32, #tpu.memory_space<vmem>>, vector<16x1xf32>
      tpu.vector_store %arg15[%c0, %c0_5], %11 {strides = array<i32>} : memref<16x1xf32, #tpu.memory_space<vmem>>, vector<16x1xf32>,
      %cst_6 = arith.constant 0.000000e+00 : f32
      %13 = vector.broadcast %cst_6 : f32 to vector<16x1xf32>
      %c0_7 = arith.constant 0 : index
      %c0_8 = arith.constant 0 : index
      %14 = vector.load %arg16[%c0_7, %c0_8] : memref<16x1xf32, #tpu.memory_space<vmem>>, vector<16x1xf32>
      tpu.vector_store %arg16[%c0_7, %c0_8], %13 {strides = array<i32>} : memref<16x1xf32, #tpu.memory_space<vmem>>, vector<16x1xf32>,
    } else {
    }
    %c0_i32_2 = arith.constant 0 : i32
    %5 = arith.cmpi eq, %arg0, %c0_i32_2 : i32
    %6 = arith.extui %5 : i1 to i32
    %c0_i32_3 = arith.constant 0 : i32
    %7 = arith.cmpi ne, %6, %c0_i32_3 : i32
    scf.if %7 {
      %c0 = arith.constant 0 : index
      %c0_5 = arith.constant 0 : index
      %c0_6 = arith.constant 0 : index
      %11 = vector.load %arg2[%c0, %c0_5, %c0_6] : memref<1x8x512xbf16, #tpu.memory_space<vmem>>, vector<1x8x512xbf16>
      %12 = vector.shape_cast %11 : vector<1x8x512xbf16> to vector<8x512xbf16>
      %c0_7 = arith.constant 0 : index
      %c0_8 = arith.constant 0 : index
      %13 = vector.load %arg3[%c0_7, %c0_8] : memref<8x8xbf16, #tpu.memory_space<vmem>>, vector<8x8xbf16>
      %cst = arith.constant dense<0.000000e+00> : vector<8x512xf32>
      %14 = tpu.matmul %13, %12, %cst {dimension_numbers = #tpu.dot_dimension_numbers<[1], [0], [0], [1], [0, 0, 1, 1], [], []>} : vector<8x8xbf16>, vector<8x512xbf16>, vector<8x512xf32> -> vector<8x512xf32>
      %c511_i32 = arith.constant 511 : i32
      %15 = tpu.dynamic_rotate %14 by %c511_i32 dim 1 : vector<8x512xf32>, i32 -> vector<8x512xf32>
      %c1_i32_9 = arith.constant 1 : i32
      %16 = tpu.dynamic_rotate %14 by %c1_i32_9 dim 1 : vector<8x512xf32>, i32 -> vector<8x512xf32>
      %c510_i32 = arith.constant 510 : i32
      %17 = tpu.dynamic_rotate %14 by %c510_i32 dim 1 : vector<8x512xf32>, i32 -> vector<8x512xf32>
      %c2_i32 = arith.constant 2 : i32
      %18 = tpu.dynamic_rotate %14 by %c2_i32 dim 1 : vector<8x512xf32>, i32 -> vector<8x512xf32>
      %c0_10 = arith.constant 0 : index
      %c0_11 = arith.constant 0 : index
      %c0_12 = arith.constant 0 : index
      %19 = vector.load %arg4[%c0_10, %c0_11, %c0_12] : memref<9x8x1xf32, #tpu.memory_space<vmem>>, vector<1x8x1xf32>
      %20 = vector.shape_cast %19 : vector<1x8x1xf32> to vector<8x1xf32>
      %21 = vector.broadcast %20 : vector<8x1xf32> to vector<8x512xf32>
      %22 = arith.mulf %16, %21 : vector<8x512xf32>
      %c1 = arith.constant 1 : index
      %c0_13 = arith.constant 0 : index
      %c0_14 = arith.constant 0 : index
      %23 = vector.load %arg4[%c1, %c0_13, %c0_14] : memref<9x8x1xf32, #tpu.memory_space<vmem>>, vector<1x8x1xf32>
      %24 = vector.shape_cast %23 : vector<1x8x1xf32> to vector<8x1xf32>
      %25 = vector.broadcast %24 : vector<8x1xf32> to vector<8x512xf32>
      %26 = arith.mulf %14, %25 : vector<8x512xf32>
      %27 = arith.addf %22, %26 : vector<8x512xf32>
      %c2 = arith.constant 2 : index
      %c0_15 = arith.constant 0 : index
      %c0_16 = arith.constant 0 : index
      %28 = vector.load %arg4[%c2, %c0_15, %c0_16] : memref<9x8x1xf32, #tpu.memory_space<vmem>>, vector<1x8x1xf32>
      %29 = vector.shape_cast %28 : vector<1x8x1xf32> to vector<8x1xf32>
      %30 = vector.broadcast %29 : vector<8x1xf32> to vector<8x512xf32>
      %31 = arith.mulf %15, %30 : vector<8x512xf32>
      %32 = arith.addf %27, %31 : vector<8x512xf32>
      %c20_i32 = arith.constant 20 : i32
      %33 = tpu.dynamic_rotate %32 by %c20_i32 dim 1 : vector<8x512xf32>, i32 -> vector<8x512xf32>
      %c3 = arith.constant 3 : index
      %c0_17 = arith.constant 0 : index
      %c0_18 = arith.constant 0 : index
      %34 = vector.load %arg4[%c3, %c0_17, %c0_18] : memref<9x8x1xf32, #tpu.memory_space<vmem>>, vector<1x8x1xf32>
      %35 = vector.shape_cast %34 : vector<1x8x1xf32> to vector<8x1xf32>
      %36 = vector.broadcast %35 : vector<8x1xf32> to vector<8x512xf32>
      %37 = arith.mulf %16, %36 : vector<8x512xf32>
      %c4 = arith.constant 4 : index
      %c0_19 = arith.constant 0 : index
      %c0_20 = arith.constant 0 : index
      %38 = vector.load %arg4[%c4, %c0_19, %c0_20] : memref<9x8x1xf32, #tpu.memory_space<vmem>>, vector<1x8x1xf32>
      %39 = vector.shape_cast %38 : vector<1x8x1xf32> to vector<8x1xf32>
      %40 = vector.broadcast %39 : vector<8x1xf32> to vector<8x512xf32>
      %41 = arith.mulf %14, %40 : vector<8x512xf32>
      %42 = arith.addf %37, %41 : vector<8x512xf32>
      %c5 = arith.constant 5 : index
      %c0_21 = arith.constant 0 : index
      %c0_22 = arith.constant 0 : index
      %43 = vector.load %arg4[%c5, %c0_21, %c0_22] : memref<9x8x1xf32, #tpu.memory_space<vmem>>, vector<1x8x1xf32>
      %44 = vector.shape_cast %43 : vector<1x8x1xf32> to vector<8x1xf32>
      %45 = vector.broadcast %44 : vector<8x1xf32> to vector<8x512xf32>
      %46 = arith.mulf %15, %45 : vector<8x512xf32>
      %47 = arith.addf %42, %46 : vector<8x512xf32>
      %48 = arith.addf %33, %47 : vector<8x512xf32>
      %c6 = arith.constant 6 : index
      %c0_23 = arith.constant 0 : index
      %c0_24 = arith.constant 0 : index
      %49 = vector.load %arg4[%c6, %c0_23, %c0_24] : memref<9x8x1xf32, #tpu.memory_space<vmem>>, vector<1x8x1xf32>
      %50 = vector.shape_cast %49 : vector<1x8x1xf32> to vector<8x1xf32>
      %51 = vector.broadcast %50 : vector<8x1xf32> to vector<8x512xf32>
      %52 = arith.mulf %16, %51 : vector<8x512xf32>
      %c7 = arith.constant 7 : index
      %c0_25 = arith.constant 0 : index
      %c0_26 = arith.constant 0 : index
      %53 = vector.load %arg4[%c7, %c0_25, %c0_26] : memref<9x8x1xf32, #tpu.memory_space<vmem>>, vector<1x8x1xf32>
      %54 = vector.shape_cast %53 : vector<1x8x1xf32> to vector<8x1xf32>
      %55 = vector.broadcast %54 : vector<8x1xf32> to vector<8x512xf32>
      %56 = arith.mulf %14, %55 : vector<8x512xf32>
      %57 = arith.addf %52, %56 : vector<8x512xf32>
      %c8 = arith.constant 8 : index
      %c0_27 = arith.constant 0 : index
      %c0_28 = arith.constant 0 : index
      %58 = vector.load %arg4[%c8, %c0_27, %c0_28] : memref<9x8x1xf32, #tpu.memory_space<vmem>>, vector<1x8x1xf32>
      %59 = vector.shape_cast %58 : vector<1x8x1xf32> to vector<8x1xf32>
      %60 = vector.broadcast %59 : vector<8x1xf32> to vector<8x512xf32>
      %61 = arith.mulf %15, %60 : vector<8x512xf32>
      %62 = arith.addf %57, %61 : vector<8x512xf32>
      %c492_i32 = arith.constant 492 : i32
      %63 = tpu.dynamic_rotate %62 by %c492_i32 dim 1 : vector<8x512xf32>, i32 -> vector<8x512xf32>
      %64 = arith.addf %48, %63 : vector<8x512xf32>
      %c0_29 = arith.constant 0 : index
      %c0_30 = arith.constant 0 : index
      %c0_31 = arith.constant 0 : index
      %65 = vector.load %arg5[%c0_29, %c0_30, %c0_31] : memref<25x8x1xf32, #tpu.memory_space<vmem>>, vector<1x8x1xf32>
      %66 = vector.shape_cast %65 : vector<1x8x1xf32> to vector<8x1xf32>
      %67 = vector.broadcast %66 : vector<8x1xf32> to vector<8x512xf32>
      %68 = arith.mulf %18, %67 : vector<8x512xf32>
      %c1_32 = arith.constant 1 : index
      %c0_33 = arith.constant 0 : index
      %c0_34 = arith.constant 0 : index
      %69 = vector.load %arg5[%c1_32, %c0_33, %c0_34] : memref<25x8x1xf32, #tpu.memory_space<vmem>>, vector<1x8x1xf32>
      %70 = vector.shape_cast %69 : vector<1x8x1xf32> to vector<8x1xf32>
      %71 = vector.broadcast %70 : vector<8x1xf32> to vector<8x512xf32>
      %72 = arith.mulf %16, %71 : vector<8x512xf32>
      %73 = arith.addf %68, %72 : vector<8x512xf32>
      %c2_35 = arith.constant 2 : index
      %c0_36 = arith.constant 0 : index
      %c0_37 = arith.constant 0 : index
      %74 = vector.load %arg5[%c2_35, %c0_36, %c0_37] : memref<25x8x1xf32, #tpu.memory_space<vmem>>, vector<1x8x1xf32>
      %75 = vector.shape_cast %74 : vector<1x8x1xf32> to vector<8x1xf32>
      %76 = vector.broadcast %75 : vector<8x1xf32> to vector<8x512xf32>
      %77 = arith.mulf %14, %76 : vector<8x512xf32>
      %78 = arith.addf %73, %77 : vector<8x512xf32>
      %c3_38 = arith.constant 3 : index
      %c0_39 = arith.constant 0 : index
      %c0_40 = arith.constant 0 : index
      %79 = vector.load %arg5[%c3_38, %c0_39, %c0_40] : memref<25x8x1xf32, #tpu.memory_space<vmem>>, vector<1x8x1xf32>
      %80 = vector.shape_cast %79 : vector<1x8x1xf32> to vector<8x1xf32>
      %81 = vector.broadcast %80 : vector<8x1xf32> to vector<8x512xf32>
      %82 = arith.mulf %15, %81 : vector<8x512xf32>
      %83 = arith.addf %78, %82 : vector<8x512xf32>
      %c4_41 = arith.constant 4 : index
      %c0_42 = arith.constant 0 : index
      %c0_43 = arith.constant 0 : index
      %84 = vector.load %arg5[%c4_41, %c0_42, %c0_43] : memref<25x8x1xf32, #tpu.memory_space<vmem>>, vector<1x8x1xf32>
      %85 = vector.shape_cast %84 : vector<1x8x1xf32> to vector<8x1xf32>
      %86 = vector.broadcast %85 : vector<8x1xf32> to vector<8x512xf32>
      %87 = arith.mulf %17, %86 : vector<8x512xf32>
      %88 = arith.addf %83, %87 : vector<8x512xf32>
      %c40_i32 = arith.constant 40 : i32
      %89 = tpu.dynamic_rotate %88 by %c40_i32 dim 1 : vector<8x512xf32>, i32 -> vector<8x512xf32>
      %c5_44 = arith.constant 5 : index
      %c0_45 = arith.constant 0 : index
      %c0_46 = arith.constant 0 : index
      %90 = vector.load %arg5[%c5_44, %c0_45, %c0_46] : memref<25x8x1xf32, #tpu.memory_space<vmem>>, vector<1x8x1xf32>
      %91 = vector.shape_cast %90 : vector<1x8x1xf32> to vector<8x1xf32>
      %92 = vector.broadcast %91 : vector<8x1xf32> to vector<8x512xf32>
      %93 = arith.mulf %18, %92 : vector<8x512xf32>
      %c6_47 = arith.constant 6 : index
      %c0_48 = arith.constant 0 : index
      %c0_49 = arith.constant 0 : index
      %94 = vector.load %arg5[%c6_47, %c0_48, %c0_49] : memref<25x8x1xf32, #tpu.memory_space<vmem>>, vector<1x8x1xf32>
      %95 = vector.shape_cast %94 : vector<1x8x1xf32> to vector<8x1xf32>
      %96 = vector.broadcast %95 : vector<8x1xf32> to vector<8x512xf32>
      %97 = arith.mulf %16, %96 : vector<8x512xf32>
      %98 = arith.addf %93, %97 : vector<8x512xf32>
      %c7_50 = arith.constant 7 : index
      %c0_51 = arith.constant 0 : index
      %c0_52 = arith.constant 0 : index
      %99 = vector.load %arg5[%c7_50, %c0_51, %c0_52] : memref<25x8x1xf32, #tpu.memory_space<vmem>>, vector<1x8x1xf32>
      %100 = vector.shape_cast %99 : vector<1x8x1xf32> to vector<8x1xf32>
      %101 = vector.broadcast %100 : vector<8x1xf32> to vector<8x512xf32>
      %102 = arith.mulf %14, %101 : vector<8x512xf32>
      %103 = arith.addf %98, %102 : vector<8x512xf32>
      %c8_53 = arith.constant 8 : index
      %c0_54 = arith.constant 0 : index
      %c0_55 = arith.constant 0 : index
      %104 = vector.load %arg5[%c8_53, %c0_54, %c0_55] : memref<25x8x1xf32, #tpu.memory_space<vmem>>, vector<1x8x1xf32>
      %105 = vector.shape_cast %104 : vector<1x8x1xf32> to vector<8x1xf32>
      %106 = vector.broadcast %105 : vector<8x1xf32> to vector<8x512xf32>
      %107 = arith.mulf %15, %106 : vector<8x512xf32>
      %108 = arith.addf %103, %107 : vector<8x512xf32>
      %c9 = arith.constant 9 : index
      %c0_56 = arith.constant 0 : index
      %c0_57 = arith.constant 0 : index
      %109 = vector.load %arg5[%c9, %c0_56, %c0_57] : memref<25x8x1xf32, #tpu.memory_space<vmem>>, vector<1x8x1xf32>
      %110 = vector.shape_cast %109 : vector<1x8x1xf32> to vector<8x1xf32>
      %111 = vector.broadcast %110 : vector<8x1xf32> to vector<8x512xf32>
      %112 = arith.mulf %17, %111 : vector<8x512xf32>
      %113 = arith.addf %108, %112 : vector<8x512xf32>
      %c20_i32_58 = arith.constant 20 : i32
      %114 = tpu.dynamic_rotate %113 by %c20_i32_58 dim 1 : vector<8x512xf32>, i32 -> vector<8x512xf32>
      %115 = arith.addf %89, %114 : vector<8x512xf32>
      %c10 = arith.constant 10 : index
      %c0_59 = arith.constant 0 : index
      %c0_60 = arith.constant 0 : index
      %116 = vector.load %arg5[%c10, %c0_59, %c0_60] : memref<25x8x1xf32, #tpu.memory_space<vmem>>, vector<1x8x1xf32>
      %117 = vector.shape_cast %116 : vector<1x8x1xf32> to vector<8x1xf32>
      %118 = vector.broadcast %117 : vector<8x1xf32> to vector<8x512xf32>
      %119 = arith.mulf %18, %118 : vector<8x512xf32>
      %c11 = arith.constant 11 : index
      %c0_61 = arith.constant 0 : index
      %c0_62 = arith.constant 0 : index
      %120 = vector.load %arg5[%c11, %c0_61, %c0_62] : memref<25x8x1xf32, #tpu.memory_space<vmem>>, vector<1x8x1xf32>
      %121 = vector.shape_cast %120 : vector<1x8x1xf32> to vector<8x1xf32>
      %122 = vector.broadcast %121 : vector<8x1xf32> to vector<8x512xf32>
      %123 = arith.mulf %16, %122 : vector<8x512xf32>
      %124 = arith.addf %119, %123 : vector<8x512xf32>
      %c12 = arith.constant 12 : index
      %c0_63 = arith.constant 0 : index
      %c0_64 = arith.constant 0 : index
      %125 = vector.load %arg5[%c12, %c0_63, %c0_64] : memref<25x8x1xf32, #tpu.memory_space<vmem>>, vector<1x8x1xf32>
      %126 = vector.shape_cast %125 : vector<1x8x1xf32> to vector<8x1xf32>
      %127 = vector.broadcast %126 : vector<8x1xf32> to vector<8x512xf32>
      %128 = arith.mulf %14, %127 : vector<8x512xf32>
      %129 = arith.addf %124, %128 : vector<8x512xf32>
      %c13 = arith.constant 13 : index
      %c0_65 = arith.constant 0 : index
      %c0_66 = arith.constant 0 : index
      %130 = vector.load %arg5[%c13, %c0_65, %c0_66] : memref<25x8x1xf32, #tpu.memory_space<vmem>>, vector<1x8x1xf32>
      %131 = vector.shape_cast %130 : vector<1x8x1xf32> to vector<8x1xf32>
      %132 = vector.broadcast %131 : vector<8x1xf32> to vector<8x512xf32>
      %133 = arith.mulf %15, %132 : vector<8x512xf32>
      %134 = arith.addf %129, %133 : vector<8x512xf32>
      %c14 = arith.constant 14 : index
      %c0_67 = arith.constant 0 : index
      %c0_68 = arith.constant 0 : index
      %135 = vector.load %arg5[%c14, %c0_67, %c0_68] : memref<25x8x1xf32, #tpu.memory_space<vmem>>, vector<1x8x1xf32>
      %136 = vector.shape_cast %135 : vector<1x8x1xf32> to vector<8x1xf32>
      %137 = vector.broadcast %136 : vector<8x1xf32> to vector<8x512xf32>
      %138 = arith.mulf %17, %137 : vector<8x512xf32>
      %139 = arith.addf %134, %138 : vector<8x512xf32>
      %140 = arith.addf %115, %139 : vector<8x512xf32>
      %c15 = arith.constant 15 : index
      %c0_69 = arith.constant 0 : index
      %c0_70 = arith.constant 0 : index
      %141 = vector.load %arg5[%c15, %c0_69, %c0_70] : memref<25x8x1xf32, #tpu.memory_space<vmem>>, vector<1x8x1xf32>
      %142 = vector.shape_cast %141 : vector<1x8x1xf32> to vector<8x1xf32>
      %143 = vector.broadcast %142 : vector<8x1xf32> to vector<8x512xf32>
      %144 = arith.mulf %18, %143 : vector<8x512xf32>
      %c16 = arith.constant 16 : index
      %c0_71 = arith.constant 0 : index
      %c0_72 = arith.constant 0 : index
      %145 = vector.load %arg5[%c16, %c0_71, %c0_72] : memref<25x8x1xf32, #tpu.memory_space<vmem>>, vector<1x8x1xf32>
      %146 = vector.shape_cast %145 : vector<1x8x1xf32> to vector<8x1xf32>
      %147 = vector.broadcast %146 : vector<8x1xf32> to vector<8x512xf32>
      %148 = arith.mulf %16, %147 : vector<8x512xf32>
      %149 = arith.addf %144, %148 : vector<8x512xf32>
      %c17 = arith.constant 17 : index
      %c0_73 = arith.constant 0 : index
      %c0_74 = arith.constant 0 : index
      %150 = vector.load %arg5[%c17, %c0_73, %c0_74] : memref<25x8x1xf32, #tpu.memory_space<vmem>>, vector<1x8x1xf32>
      %151 = vector.shape_cast %150 : vector<1x8x1xf32> to vector<8x1xf32>
      %152 = vector.broadcast %151 : vector<8x1xf32> to vector<8x512xf32>
      %153 = arith.mulf %14, %152 : vector<8x512xf32>
      %154 = arith.addf %149, %153 : vector<8x512xf32>
      %c18 = arith.constant 18 : index
      %c0_75 = arith.constant 0 : index
      %c0_76 = arith.constant 0 : index
      %155 = vector.load %arg5[%c18, %c0_75, %c0_76] : memref<25x8x1xf32, #tpu.memory_space<vmem>>, vector<1x8x1xf32>
      %156 = vector.shape_cast %155 : vector<1x8x1xf32> to vector<8x1xf32>
      %157 = vector.broadcast %156 : vector<8x1xf32> to vector<8x512xf32>
      %158 = arith.mulf %15, %157 : vector<8x512xf32>
      %159 = arith.addf %154, %158 : vector<8x512xf32>
      %c19 = arith.constant 19 : index
      %c0_77 = arith.constant 0 : index
      %c0_78 = arith.constant 0 : index
      %160 = vector.load %arg5[%c19, %c0_77, %c0_78] : memref<25x8x1xf32, #tpu.memory_space<vmem>>, vector<1x8x1xf32>
      %161 = vector.shape_cast %160 : vector<1x8x1xf32> to vector<8x1xf32>
      %162 = vector.broadcast %161 : vector<8x1xf32> to vector<8x512xf32>
      %163 = arith.mulf %17, %162 : vector<8x512xf32>
      %164 = arith.addf %159, %163 : vector<8x512xf32>
      %c492_i32_79 = arith.constant 492 : i32
      %165 = tpu.dynamic_rotate %164 by %c492_i32_79 dim 1 : vector<8x512xf32>, i32 -> vector<8x512xf32>
      %166 = arith.addf %140, %165 : vector<8x512xf32>
      %c20 = arith.constant 20 : index
      %c0_80 = arith.constant 0 : index
      %c0_81 = arith.constant 0 : index
      %167 = vector.load %arg5[%c20, %c0_80, %c0_81] : memref<25x8x1xf32, #tpu.memory_space<vmem>>, vector<1x8x1xf32>
      %168 = vector.shape_cast %167 : vector<1x8x1xf32> to vector<8x1xf32>
      %169 = vector.broadcast %168 : vector<8x1xf32> to vector<8x512xf32>
      %170 = arith.mulf %18, %169 : vector<8x512xf32>
      %c21 = arith.constant 21 : index
      %c0_82 = arith.constant 0 : index
      %c0_83 = arith.constant 0 : index
      %171 = vector.load %arg5[%c21, %c0_82, %c0_83] : memref<25x8x1xf32, #tpu.memory_space<vmem>>, vector<1x8x1xf32>
      %172 = vector.shape_cast %171 : vector<1x8x1xf32> to vector<8x1xf32>
      %173 = vector.broadcast %172 : vector<8x1xf32> to vector<8x512xf32>
      %174 = arith.mulf %16, %173 : vector<8x512xf32>
      %175 = arith.addf %170, %174 : vector<8x512xf32>
      %c22 = arith.constant 22 : index
      %c0_84 = arith.constant 0 : index
      %c0_85 = arith.constant 0 : index
      %176 = vector.load %arg5[%c22, %c0_84, %c0_85] : memref<25x8x1xf32, #tpu.memory_space<vmem>>, vector<1x8x1xf32>
      %177 = vector.shape_cast %176 : vector<1x8x1xf32> to vector<8x1xf32>
      %178 = vector.broadcast %177 : vector<8x1xf32> to vector<8x512xf32>
      %179 = arith.mulf %14, %178 : vector<8x512xf32>
      %180 = arith.addf %175, %179 : vector<8x512xf32>
      %c23 = arith.constant 23 : index
      %c0_86 = arith.constant 0 : index
      %c0_87 = arith.constant 0 : index
      %181 = vector.load %arg5[%c23, %c0_86, %c0_87] : memref<25x8x1xf32, #tpu.memory_space<vmem>>, vector<1x8x1xf32>
      %182 = vector.shape_cast %181 : vector<1x8x1xf32> to vector<8x1xf32>
      %183 = vector.broadcast %182 : vector<8x1xf32> to vector<8x512xf32>
      %184 = arith.mulf %15, %183 : vector<8x512xf32>
      %185 = arith.addf %180, %184 : vector<8x512xf32>
      %c24 = arith.constant 24 : index
      %c0_88 = arith.constant 0 : index
      %c0_89 = arith.constant 0 : index
      %186 = vector.load %arg5[%c24, %c0_88, %c0_89] : memref<25x8x1xf32, #tpu.memory_space<vmem>>, vector<1x8x1xf32>
      %187 = vector.shape_cast %186 : vector<1x8x1xf32> to vector<8x1xf32>
      %188 = vector.broadcast %187 : vector<8x1xf32> to vector<8x512xf32>
      %189 = arith.mulf %17, %188 : vector<8x512xf32>
      %190 = arith.addf %185, %189 : vector<8x512xf32>
      %c472_i32 = arith.constant 472 : i32
      %191 = tpu.dynamic_rotate %190 by %c472_i32 dim 1 : vector<8x512xf32>, i32 -> vector<8x512xf32>
      %192 = arith.addf %166, %191 : vector<8x512xf32>
      %193 = arith.negf %64 : vector<8x512xf32>
      %194 = math.exp %193 : vector<8x512xf32>
      %cst_90 = arith.constant 1.000000e+00 : f32
      %195 = vector.broadcast %cst_90 : f32 to vector<8x512xf32>
      %196 = arith.addf %195, %194 : vector<8x512xf32>
      %197 = arith.divf %195, %196 : vector<8x512xf32>
      %198 = arith.mulf %192, %197 : vector<8x512xf32>
      %199 = arith.negf %192 : vector<8x512xf32>
      %200 = math.exp %199 : vector<8x512xf32>
      %cst_91 = arith.constant 1.000000e+00 : f32
      %201 = vector.broadcast %cst_91 : f32 to vector<8x512xf32>
      %202 = arith.addf %201, %200 : vector<8x512xf32>
      %203 = arith.divf %201, %202 : vector<8x512xf32>
      %204 = arith.mulf %64, %203 : vector<8x512xf32>
      %205 = arith.addf %198, %204 : vector<8x512xf32>
      %c0_92 = arith.constant 0 : index
      %c0_93 = arith.constant 0 : index
      %206 = vector.load %arg6[%c0_92, %c0_93] : memref<16x8xbf16, #tpu.memory_space<vmem>>, vector<16x8xbf16>
      %207 = arith.truncf %205 : vector<8x512xf32> to vector<8x512xbf16>
      %cst_94 = arith.constant dense<0.000000e+00> : vector<16x512xf32>
      %208 = tpu.matmul %206, %207, %cst_94 {dimension_numbers = #tpu.dot_dimension_numbers<[1], [0], [0], [1], [0, 0, 1, 1], [], []>} : vector<16x8xbf16>, vector<8x512xbf16>, vector<16x512xf32> -> vector<16x512xf32>
      %209 = arith.index_cast %arg1 : i32 to index
      %c0_95 = arith.constant 0 : index
      %c0_96 = arith.constant 0 : index
      %210 = vector.load %arg14[%209, %c0_95, %c0_96] : memref<2x16x512xf32, #tpu.memory_space<vmem>>, vector<1x16x512xf32>
      %211 = vector.shape_cast %210 : vector<1x16x512xf32> to vector<16x512xf32>
      %212 = vector.shape_cast %208 : vector<16x512xf32> to vector<1x16x512xf32>
      tpu.vector_store %arg14[%209, %c0_95, %c0_96], %212 {strides = array<i32>} : memref<2x16x512xf32, #tpu.memory_space<vmem>>, vector<1x16x512xf32>,
      %c0_97 = arith.constant 0 : index
      %c0_98 = arith.constant 0 : index
      %213 = vector.load %arg11[%c0_97, %c0_98] : memref<512x1xf32, #tpu.memory_space<vmem>>, vector<512x1xf32>
      %c0_99 = arith.constant 0 : index
      %c0_100 = arith.constant 0 : index
      %214 = vector.load %arg15[%c0_99, %c0_100] : memref<16x1xf32, #tpu.memory_space<vmem>>, vector<16x1xf32>
      %cst_101 = arith.constant dense<0.000000e+00> : vector<16x1xf32>
      %215 = tpu.matmul %208, %213, %cst_101 {dimension_numbers = #tpu.dot_dimension_numbers<[1], [0], [0], [1], [0, 0, 1, 1], [], []>} : vector<16x512xf32>, vector<512x1xf32>, vector<16x1xf32> -> vector<16x1xf32>
      %216 = arith.addf %214, %215 : vector<16x1xf32>
      %c0_102 = arith.constant 0 : index
      %c0_103 = arith.constant 0 : index
      %217 = vector.load %arg15[%c0_102, %c0_103] : memref<16x1xf32, #tpu.memory_space<vmem>>, vector<16x1xf32>
      tpu.vector_store %arg15[%c0_102, %c0_103], %216 {strides = array<i32>} : memref<16x1xf32, #tpu.memory_space<vmem>>, vector<16x1xf32>,
      %c0_104 = arith.constant 0 : index
      %c0_105 = arith.constant 0 : index
      %218 = vector.load %arg16[%c0_104, %c0_105] : memref<16x1xf32, #tpu.memory_space<vmem>>, vector<16x1xf32>
      %219 = arith.mulf %208, %208 : vector<16x512xf32>
      %cst_106 = arith.constant dense<0.000000e+00> : vector<16x1xf32>
      %220 = tpu.matmul %219, %213, %cst_106 {dimension_numbers = #tpu.dot_dimension_numbers<[1], [0], [0], [1], [0, 0, 1, 1], [], []>} : vector<16x512xf32>, vector<512x1xf32>, vector<16x1xf32> -> vector<16x1xf32>
      %221 = arith.addf %218, %220 : vector<16x1xf32>
      %c0_107 = arith.constant 0 : index
      %c0_108 = arith.constant 0 : index
      %222 = vector.load %arg16[%c0_107, %c0_108] : memref<16x1xf32, #tpu.memory_space<vmem>>, vector<16x1xf32>
      tpu.vector_store %arg16[%c0_107, %c0_108], %221 {strides = array<i32>} : memref<16x1xf32, #tpu.memory_space<vmem>>, vector<16x1xf32>,
      %cst_109 = arith.constant 0.000000e+00 : f32
      %223 = vector.broadcast %cst_109 : f32 to vector<1x16x128xf32>
      %c0_110 = arith.constant 0 : index
      %c0_111 = arith.constant 0 : index
      %c0_112 = arith.constant 0 : index
      %224 = vector.load %arg13[%c0_110, %c0_111, %c0_112] : memref<1x16x128xf32, #tpu.memory_space<vmem>>, vector<1x16x128xf32>
      tpu.vector_store %arg13[%c0_110, %c0_111, %c0_112], %223 {strides = array<i32>} : memref<1x16x128xf32, #tpu.memory_space<vmem>>, vector<1x16x128xf32>,
    } else {
    }
    %c1_i32 = arith.constant 1 : i32
    %8 = arith.cmpi eq, %arg0, %c1_i32 : i32
    %9 = arith.extui %8 : i1 to i32
    %c0_i32_4 = arith.constant 0 : i32
    %10 = arith.cmpi ne, %9, %c0_i32_4 : i32
    scf.if %10 {
      %c0 = arith.constant 0 : index
      %c0_5 = arith.constant 0 : index
      %11 = vector.load %arg15[%c0, %c0_5] : memref<16x1xf32, #tpu.memory_space<vmem>>, vector<16x1xf32>
      %cst = arith.constant 0.001953125 : f32
      %12 = vector.broadcast %cst : f32 to vector<16x1xf32>
      %13 = arith.mulf %11, %12 : vector<16x1xf32>
      %c0_6 = arith.constant 0 : index
      %c0_7 = arith.constant 0 : index
      %14 = vector.load %arg16[%c0_6, %c0_7] : memref<16x1xf32, #tpu.memory_space<vmem>>, vector<16x1xf32>
      %cst_8 = arith.constant 0.001953125 : f32
      %15 = vector.broadcast %cst_8 : f32 to vector<16x1xf32>
      %16 = arith.mulf %14, %15 : vector<16x1xf32>
      %17 = arith.mulf %13, %13 : vector<16x1xf32>
      %18 = arith.subf %16, %17 : vector<16x1xf32>
      %cst_9 = arith.constant 0.000000e+00 : f32
      %19 = vector.broadcast %cst_9 : f32 to vector<16x1xf32>
      %20 = arith.maximumf %18, %19 : vector<16x1xf32>
      %c0_10 = arith.constant 0 : index
      %c0_11 = arith.constant 0 : index
      %21 = vector.load %arg9[%c0_10, %c0_11] : memref<16x1xf32, #tpu.memory_space<vmem>>, vector<16x1xf32>
      %cst_12 = arith.constant 9.99999974E-6 : f32
      %22 = vector.broadcast %cst_12 : f32 to vector<16x1xf32>
      %23 = arith.addf %20, %22 : vector<16x1xf32>
      %24 = math.rsqrt %23 : vector<16x1xf32>
      %25 = arith.mulf %21, %24 : vector<16x1xf32>
      %c0_13 = arith.constant 0 : index
      %c0_14 = arith.constant 0 : index
      %26 = vector.load %arg10[%c0_13, %c0_14] : memref<16x1xf32, #tpu.memory_space<vmem>>, vector<16x1xf32>
      %27 = arith.mulf %13, %25 : vector<16x1xf32>
      %28 = arith.subf %26, %27 : vector<16x1xf32>
      %29 = arith.index_cast %arg1 : i32 to index
      %c0_15 = arith.constant 0 : index
      %c0_16 = arith.constant 0 : index
      %30 = vector.load %arg14[%29, %c0_15, %c0_16] : memref<2x16x512xf32, #tpu.memory_space<vmem>>, vector<1x16x512xf32>
      %31 = vector.shape_cast %30 : vector<1x16x512xf32> to vector<16x512xf32>
      %32 = vector.broadcast %25 : vector<16x1xf32> to vector<16x512xf32>
      %33 = arith.mulf %31, %32 : vector<16x512xf32>
      %34 = vector.broadcast %28 : vector<16x1xf32> to vector<16x512xf32>
      %35 = arith.addf %33, %34 : vector<16x512xf32>
      %c0_17 = arith.constant 0 : index
      %c0_18 = arith.constant 0 : index
      %36 = vector.load %arg7[%c0_17, %c0_18] : memref<16x8xbf16, #tpu.memory_space<vmem>>, vector<16x8xbf16>
      %c0_19 = arith.constant 0 : index
      %c0_20 = arith.constant 0 : index
      %c0_21 = arith.constant 0 : index
      %37 = vector.load %arg2[%c0_19, %c0_20, %c0_21] : memref<1x8x512xbf16, #tpu.memory_space<vmem>>, vector<1x8x512xbf16>
      %38 = vector.shape_cast %37 : vector<1x8x512xbf16> to vector<8x512xbf16>
      %cst_22 = arith.constant dense<0.000000e+00> : vector<16x512xf32>
      %39 = tpu.matmul %36, %38, %cst_22 {dimension_numbers = #tpu.dot_dimension_numbers<[1], [0], [0], [1], [0, 0, 1, 1], [], []>} : vector<16x8xbf16>, vector<8x512xbf16>, vector<16x512xf32> -> vector<16x512xf32>
      %c0_23 = arith.constant 0 : index
      %c0_24 = arith.constant 0 : index
      %40 = vector.load %arg8[%c0_23, %c0_24] : memref<16x1xf32, #tpu.memory_space<vmem>>, vector<16x1xf32>
      %41 = vector.broadcast %40 : vector<16x1xf32> to vector<16x512xf32>
      %42 = arith.addf %39, %41 : vector<16x512xf32>
      %43 = arith.addf %35, %42 : vector<16x512xf32>
      %c511_i32 = arith.constant 511 : i32
      %44 = tpu.dynamic_rotate %43 by %c511_i32 dim 1 : vector<16x512xf32>, i32 -> vector<16x512xf32>
      %45 = arith.maximumf %43, %44 : vector<16x512xf32>
      %c492_i32 = arith.constant 492 : i32
      %46 = tpu.dynamic_rotate %45 by %c492_i32 dim 1 : vector<16x512xf32>, i32 -> vector<16x512xf32>
      %47 = arith.maximumf %45, %46 : vector<16x512xf32>
      %c0_25 = arith.constant 0 : index
      %c0_26 = arith.constant 0 : index
      %48 = vector.load %arg12[%c0_25, %c0_26] : memref<512x128xf32, #tpu.memory_space<vmem>>, vector<512x128xf32>
      %cst_27 = arith.constant dense<0.000000e+00> : vector<16x128xf32>
      %49 = tpu.matmul %47, %48, %cst_27 {dimension_numbers = #tpu.dot_dimension_numbers<[1], [0], [0], [1], [0, 0, 1, 1], [], []>} : vector<16x512xf32>, vector<512x128xf32>, vector<16x128xf32> -> vector<16x128xf32>
      %c0_28 = arith.constant 0 : index
      %c0_29 = arith.constant 0 : index
      %c0_30 = arith.constant 0 : index
      %50 = vector.load %arg13[%c0_28, %c0_29, %c0_30] : memref<1x16x128xf32, #tpu.memory_space<vmem>>, vector<1x16x128xf32>
      %51 = vector.shape_cast %50 : vector<1x16x128xf32> to vector<16x128xf32>
      %52 = vector.shape_cast %49 : vector<16x128xf32> to vector<1x16x128xf32>
      tpu.vector_store %arg13[%c0_28, %c0_29, %c0_30], %52 {strides = array<i32>} : memref<1x16x128xf32, #tpu.memory_space<vmem>>, vector<1x16x128xf32>,
    } else {
    }
    return
  }
  func.func @transform_0(%arg0: i32, %arg1: i32) -> (i32, i32, i32) {
    %c0_i32 = arith.constant 0 : i32
    %c0_i32_0 = arith.constant 0 : i32
    %c0_i32_1 = arith.constant 0 : i32
    return %arg1, %c0_i32, %c0_i32_0 : i32, i32, i32
  }
  func.func @transform_1(%arg0: i32, %arg1: i32) -> (i32, i32) {
    %c0_i32 = arith.constant 0 : i32
    %c0_i32_0 = arith.constant 0 : i32
    %c0_i32_1 = arith.constant 0 : i32
    return %c0_i32, %c0_i32_0 : i32, i32
  }
  func.func @transform_2(%arg0: i32, %arg1: i32) -> (i32, i32, i32) {
    %c0_i32 = arith.constant 0 : i32
    %c0_i32_0 = arith.constant 0 : i32
    %c0_i32_1 = arith.constant 0 : i32
    %c0_i32_2 = arith.constant 0 : i32
    return %c0_i32, %c0_i32_0, %c0_i32_1 : i32, i32, i32
  }
  func.func @transform_3(%arg0: i32, %arg1: i32) -> (i32, i32, i32) {
    %c0_i32 = arith.constant 0 : i32
    %c0_i32_0 = arith.constant 0 : i32
    %c0_i32_1 = arith.constant 0 : i32
    %c0_i32_2 = arith.constant 0 : i32
    return %c0_i32, %c0_i32_0, %c0_i32_1 : i32, i32, i32
  }
  func.func @transform_4(%arg0: i32, %arg1: i32) -> (i32, i32) {
    %c0_i32 = arith.constant 0 : i32
    %c0_i32_0 = arith.constant 0 : i32
    %c0_i32_1 = arith.constant 0 : i32
    return %c0_i32, %c0_i32_0 : i32, i32
  }
  func.func @transform_5(%arg0: i32, %arg1: i32) -> (i32, i32) {
    %c0_i32 = arith.constant 0 : i32
    %c0_i32_0 = arith.constant 0 : i32
    %c0_i32_1 = arith.constant 0 : i32
    return %c0_i32, %c0_i32_0 : i32, i32
  }
  func.func @transform_6(%arg0: i32, %arg1: i32) -> (i32, i32) {
    %c0_i32 = arith.constant 0 : i32
    %c0_i32_0 = arith.constant 0 : i32
    %c0_i32_1 = arith.constant 0 : i32
    return %c0_i32, %c0_i32_0 : i32, i32
  }
  func.func @transform_7(%arg0: i32, %arg1: i32) -> (i32, i32) {
    %c0_i32 = arith.constant 0 : i32
    %c0_i32_0 = arith.constant 0 : i32
    %c0_i32_1 = arith.constant 0 : i32
    return %c0_i32, %c0_i32_0 : i32, i32
  }
  func.func @transform_8(%arg0: i32, %arg1: i32) -> (i32, i32) {
    %c0_i32 = arith.constant 0 : i32
    %c0_i32_0 = arith.constant 0 : i32
    %c0_i32_1 = arith.constant 0 : i32
    return %c0_i32, %c0_i32_0 : i32, i32
  }
  func.func @transform_9(%arg0: i32, %arg1: i32) -> (i32, i32) {
    %c0_i32 = arith.constant 0 : i32
    %c0_i32_0 = arith.constant 0 : i32
    %c0_i32_1 = arith.constant 0 : i32
    return %c0_i32, %c0_i32_0 : i32, i32
  }
  func.func @transform_10(%arg0: i32, %arg1: i32) -> (i32, i32) {
    %c0_i32 = arith.constant 0 : i32
    %c0_i32_0 = arith.constant 0 : i32
    %c0_i32_1 = arith.constant 0 : i32
    return %c0_i32, %c0_i32_0 : i32, i32
  }
  func.func @transform_11(%arg0: i32, %arg1: i32) -> (i32, i32, i32) {
    %c0_i32 = arith.constant 0 : i32
    %c0_i32_0 = arith.constant 0 : i32
    %c0_i32_1 = arith.constant 0 : i32
    return %arg1, %c0_i32, %c0_i32_0 : i32, i32, i32
  }
}

</mosaic_0001>

<bundles_post_ra>
// kernel: tpu_custom_call.1
= control target key start
LH: loop header
LB: loop body
LE: loop exit
PB: predicated region body
PF: predicated region fallthrough
CT: control target
= control target key end

     0   :  { %s4669_s0 = inlined_call_operand.vmem [shape: bf16[2,8,512], index: 0, kind: input, shape index: {}]   ;;  %s4670_s1 = inlined_call_operand.vmem [shape: bf16[8,8], index: 1, kind: input, shape index: {}]   ;;  %s4671_s2 = inlined_call_operand.vmem [shape: f32[9,8,1], index: 2, kind: input, shape index: {}]   ;;  %s4672_s3 = inlined_call_operand.vmem [shape: f32[25,8,1], index: 3, kind: input, shape index: {}]   ;;  %s4673_s4 = inlined_call_operand.vmem [shape: bf16[16,8], index: 4, kind: input, shape index: {}]   ;;  %s4674_s5 = inlined_call_operand.vmem [shape: bf16[16,8], index: 5, kind: input, shape index: {}]   ;;  %s4675_s6 = inlined_call_operand.vmem [shape: f32[16,1], index: 6, kind: input, shape index: {}]   ;;  %s4676_s7 = inlined_call_operand.vmem [shape: f32[16,1], index: 7, kind: input, shape index: {}]   ;;  %s4677_s8 = inlined_call_operand.vmem [shape: f32[16,1], index: 8, kind: input, shape index: {}]   ;;  %s4678_s9 = inlined_call_operand.vmem [shape: f32[512,1], index: 9, kind: input, shape index: {}]   ;;  %s4679_s10 = inlined_call_operand.vmem [shape: f32[512,128], index: 10, kind: input, shape index: {}]   ;;  %s4680_s11 = inlined_call_operand.hbm [shape: f32[2,16,128], index: 11, kind: output, shape index: {}]  }
   0x1   :  { %4704 = sst [smem:[#allocation34_spill]] %s4669_s0 }
   0x2   :  { %4705 = sst [smem:[#allocation35_spill]] %s4670_s1 }
   0x3   :  { %16 = vsyncpa [#allocation6], 0 }
   0x4   :  { %18 = vsyncpa [#allocation6 + $0x1], 0  ;;  %s3175_s17 = smov 0   ;;  %s3177_s18 = smov 0  }
   0x5   :  { %s3179_s19 = smov 0   ;;  %s3181_s20 = smov 0  }
   0x6   :  { %s3183_s21 = smov 0   ;;  %s3185_s22 = smov 0  }
   0x7   :  { %s3187_s23 = smov 0   ;;  %s3189_s24 = smov 0  }
   0x8 LB: > { %4706 = sst [smem:[#allocation8_spill]] %s3088_s22  ;;  %s2320_s25 = sadd.s32 4294967295, %s3096_s24   ;;  %s3096_s24 = sphi %s3189_s24, %s24_s24   ;;  %s3092_s23 = sphi %s3187_s23, %s4766_s23   ;;  %s3088_s22 = sphi %s3185_s22, %s4765_s22   ;;  %s3084_s21 = sphi %s3183_s21, %s4764_s21   ;;  %s3080_s20 = sphi %s3181_s20, %s4763_s20   ;;  %s3076_s19 = sphi %s3179_s19, %s4769_s19   ;;  %s3072_s18 = sphi %s3177_s18, %s4768_s18   ;;  %s3068_s17 = sphi %s3175_s17, %s4767_s17  }
   0x9   : > { %4707 = sst [smem:[#allocation9_spill]] %s3092_s23  ;;  %s2321_s26 = sadd.s32 4294967294, %s3096_s24  }
   0xa   : > { %s33_s27 = sadd.s32 1, %s3088_s22  ;;  %s36_s28 = sadd.s32 1, %s3092_s23 }
   0xb   : > { %p34_p0 = scmp.ge.s32.totalorder %s33_s27, 2  ;;  %s279_s29 = sadd.s32 1, %s3076_s19 }
   0xc   : > { %p289_p1 = scmp.ne.s32.totalorder %s3076_s19, %s3072_s18  ;;  %p290_p2 = scmp.eq.s32.totalorder %s2320_s25, 3 }
   0xd   : > { %s4771_s27 = smov (%p34_p0, %s33_s27), 0  ;;  %s4773_s28 = smov (!%p34_p0, %s36_s28), %s3092_s23 }
   0xe   : > { %4708 = sst [smem:[#allocation10_spill]] %s4771_s27  ;;  %s276_s30 = ssub.s32 %s3088_s22, %s4771_s27 }
   0xf   : > { %p3227_p3 = por %p290_p2, %p289_p1  ;;  %p38_p4 = scmp.ge.s32.totalorder %s4773_s28, 2 }
  0x10   : > { %p277_p5 = scmp.eq.s32.totalorder %s276_s30, 0  ;;  %p295_p6 = scmp.ne.s32.totalorder %s3072_s18, %s3068_s17 }
  0x11   : > { %p296_p7 = scmp.eq.s32.totalorder %s2321_s26, 3  ;;  %s4775_s28 = smov (%p38_p4, %s4773_s28), 0 }
  0x12   : > { %4710 = sst [smem:[#allocation11_spill]] %s4775_s28  ;;  %p2324_p9 = scmp.ge.s32.totalorder %s3096_s24, 1 }
  0x13   : > { %s3236_s13 = scalar_select %p277_p5, %s3076_s19, %s279_s29  }
  0x14   : > { %p3238_p8 = por %p296_p7, %p295_p6  ;;  %p352_p10 = scmp.lt.s32.totalorder %s3096_s24, 5 }
  0x16   : > { %p353_p11 = pnand %p2324_p9, %p352_p10 }
  0x17   : > { %s4682_s15 = sand.u32 (!%p353_p11), 1, %s3072_s18   ;;  %p392_p12 = scmp.lt.s32.totalorder (!%p353_p11), %s3080_s20, 1 }
  0x18   : > { %356 = sbr.rel (%p353_p11) target bundleno = 1812 (0x714), region = 64  ;;  %s2325_s16 = sshll.u32 (!%p353_p11), %s4682_s15, 4 }
  0x19   : > { %p398_p13 = scmp.eq.s32.totalorder (!%p353_p11), %s3084_s21, 0  ;;  %p399_p0 = scmp.eq.s32.totalorder (!%p353_p11), %s3080_s20, 0 }
  0x1a   : > { %s4712_s0 = sld [smem:[#allocation34_spill]] (!%p353_p11)  ;;  %s3256_s27 = scalar_lea.vmem (!%p353_p11), [#allocation5], %s2325_s16 }
  0x1b   : > { %p400_p1 = pnand (!%p353_p11), %p399_p0, %p398_p13 }
  0x1f   : > { %s393_s25 = scalar_select %p392_p12, %s3080_s20, 1 }
  0x20   : > { %403 = sbr.rel (%p400_p1) target bundleno = 39 (0x27), region = 68  ;;  %vm404_vm0 = vcmask (!%p400_p1), 7168   ;;  %v3098_v0 = vmov (!%p400_p1), 0.0  }
  0x21   : > { %s2401_s26 = sshll.u32 %s393_s25, 4  ;;  %405 = vst.msk [vmem:[#allocation3] sm:$0xff] (!%p400_p1), %vm404_vm0, %v3098_v0  ;;  %406 = vst.msk [vmem:[#allocation3 + $0x8] sm:$0xff] (!%p400_p1), %vm404_vm0, %v3098_v0 }
  0x22   : > { %s3254_s28 = scalar_lea.vmem %s4712_s0, %s2401_s26  ;;  %407 = vst.msk [vmem:[#allocation4] sm:$0xff] (!%p400_p1), %vm404_vm0, %v3098_v0  ;;  %408 = vst.msk [vmem:[#allocation4 + $0x8] sm:$0xff] (!%p400_p1), %vm404_vm0, %v3098_v0 }
  0x27 PF: > { %p2328_p2 = scmp.ne.s32.totalorder %s3084_s21, 0 }
  0x29   : > { %411 = sbr.rel (%p2328_p2) target bundleno = 1093 (0x445), region = 72 }
  0x30   : > { %v412_v1 = vld [vmem:[%s3254_s28] sm:$0xff]  ;;  %vm429_vm1 = vcmask 1043456   ;;  %v413_v2 = vld [vmem:[%s3254_s28 + $0x8] sm:$0xff]  ;;  %v3099_v7 = vmov 0   ;;  %s4713_s1 = sld [smem:[#allocation35_spill]]  ;;  %vm425_vm2 = vcmask 64512  }
  0x31   : > { %v2330_v3 = vcombine.high %v412_v1, %v412_v1  ;;  %v2329_v4 = vcombine.low %v412_v1, %v412_v1  ;;  %v2332_v5 = vcombine.high %v413_v2, %v413_v2  ;;  %v2331_v6 = vcombine.low %v413_v2, %v413_v2  ;;  %474 = vmatprep.mubr.bf16.mxu0 %v3099_v7  ;;  %v2349_v8 = vld [vmem:[%s4672_s3 + $0x28] sm:$0xff]  ;;  %v734_v11 = vld [vmem:[%s4672_s3] sm:$0xff]  ;;  %v2350_v13 = vld [vmem:[%s4672_s3 + $0x30] sm:$0xff]  ;;  %s3100_s15 = smov 127   ;;  %s3101_s30 = smov 1  }
  0x32   : > { %515 = vmatprep.mubr.bf16.mxu1 %v3099_v7  ;;  %2913 = vset.pattern.permute.xlu1 %v3099_v7  ;;  %v2345_v14 = vld [vmem:[%s4672_s3 + $0x8] sm:$0xff]  ;;  %v2351_v15 = vld [vmem:[%s4672_s3 + $0x38] sm:$0xff]  ;;  %v2346_v16 = vld [vmem:[%s4672_s3 + $0x10] sm:$0xff]  ;;  %s3102_s0 = smov 2   ;;  %s3103_s16 = smov 126   ;;  %vm1555_vm11 = vcmask 7168  }
  0x33   : > { %2333 = vmatprep.subr.msk.bf16.mxu0 %vm429_vm1, %v2330_v3  ;;  %v431_v9 = vsel %vm429_vm1, %v2329_v4, 0  ;;  %2335 = vmatprep.subr.msk.bf16.mxu1 %vm429_vm1, %v2332_v5  ;;  %v437_v10 = vsel %vm429_vm1, %v2331_v6, 0  ;;  %v2352_v17 = vld [vmem:[%s4672_s3 + $0x40] sm:$0xff]  ;;  %v2347_v18 = vld [vmem:[%s4672_s3 + $0x18] sm:$0xff]  ;;  %v2353_v21 = vld [vmem:[%s4672_s3 + $0x48] sm:$0xff]  ;;  %s3105_s25 = smov 108  }
  0x34   : > { %443 = vmatpush1.bf16.msra.mxu0 %v431_v9  ;;  %484 = vmatpush1.bf16.msra.mxu1 %v437_v10  ;;  %v2360_v19 = vld [vmem:[%s4672_s3 + $0x80] sm:$0xff]  ;;  %v2359_v20 = vld [vmem:[%s4672_s3 + $0x78] sm:$0xff]  ;;  %v2361_v24 = vld [vmem:[%s4672_s3 + $0x88] sm:$0xff]  ;;  %s3106_s26 = smov 40   ;;  %s3107_s29 = smov 88  }
  0x35   : > { %821 = vperm.xlu1 %2913, %v2349_v8   ;;  %2912 = vset.pattern.permute.xlu0 %v3099_v7  ;;  %v2348_v22 = vld [vmem:[%s4672_s3 + $0x20] sm:$0xff]  ;;  %v2365_v26 = vld [vmem:[%s4672_s3 + $0xa8] sm:$0xff]  ;;  %v2362_v27 = vld [vmem:[%s4672_s3 + $0x90] sm:$0xff]  ;;  %s2402_s22 = sshll.u32 %s3080_s20, 6 }
  0x36   : > { %v414_v12 = vld [vmem:[%s4713_s1] sm:$0xf]  ;;  %737 = vperm.xlu0 %2912, %v734_v11   ;;  %v2337_v28 = vld [vmem:[%s4671_s2 + $0x8] sm:$0xff]  ;;  %v2338_v29 = vld [vmem:[%s4671_s2 + $0x10] sm:$0xff]  ;;  %s3104_s1 = smov 20   ;;  %s1328_s23 = scalar_lea.vmem [#allocation2], %s2402_s22 }
  0x37   : > { %2334 = vmatmul.mubr.msk.bf16.vlgmr.msra.gmra.mrb[0].mxu0 %vm425_vm2, %v414_v12  ;;  %2336 = vmatmul.mubr.msk.bf16.vlgmr.msra.gmra.mrb[0].mxu1 %vm425_vm2, %v414_v12  ;;  %v2364_v23 = vld [vmem:[%s4672_s3 + $0xa0] sm:$0xff]  ;;  %v2366_v30 = vld [vmem:[%s4672_s3 + $0xb0] sm:$0xff]  ;;  %v2343_v31 = vld [vmem:[%s4671_s2 + $0x38] sm:$0xff] }
  0x38   : > { %1272 = vmatprep.mubr.bf16.mxu0 %v3099_v7  ;;  %1315 = vmatprep.mubr.bf16.mxu1 %v3099_v7  ;;  %v578_v25 = vld [vmem:[%s4671_s2] sm:$0xff]  ;;  %v2342_v32 = vld [vmem:[%s4671_s2 + $0x30] sm:$0xff]  ;;  %v2367_v33 = vld [vmem:[%s4672_s3 + $0xb8] sm:$0xff] }
  0x39   : > { %832 = vperm.xlu1 %2913, %v2350_v13   ;;  %v2363_v34 = vld [vmem:[%s4672_s3 + $0x98] sm:$0xff]  ;;  %v2344_v61 = vld [vmem:[%s4671_s2 + $0x40] sm:$0xff]  ;;  %v2354_v63 = vld [vmem:[%s4672_s3 + $0x50] sm:$0xff] }
  0x3a   : > { %748 = vperm.xlu0 %2912, %v2345_v14   ;;  %v2368_v62 = vld [vmem:[%s4672_s3 + $0xc0] sm:$0xff]  ;;  %v2355_v0 = vld [vmem:[%s4672_s3 + $0x58] sm:$0xff]  ;;  %v2357_v2 = vld [vmem:[%s4672_s3 + $0x68] sm:$0xff] }
  0x3b   : > { %v2356_v1 = vld [vmem:[%s4672_s3 + $0x60] sm:$0xff]  ;;  %v2339_v3 = vld [vmem:[%s4671_s2 + $0x18] sm:$0xff]  ;;  %v2358_v5 = vld [vmem:[%s4672_s3 + $0x70] sm:$0xff] }
  0x3c   : > { %v2340_v4 = vld [vmem:[%s4671_s2 + $0x20] sm:$0xff]  ;;  %v2341_v6 = vld [vmem:[%s4671_s2 + $0x28] sm:$0xff] }
  0x3d   : > { %847 = vperm.xlu1 %2913, %v2351_v15  }
  0x3e   : > { %763 = vperm.xlu0 %2912, %v2346_v16  }
  0x41   : > { %862 = vperm.xlu1 %2913, %v2352_v17  }
  0x42   : > { %778 = vperm.xlu0 %2912, %v2347_v18  }
  0x45   : > { %994 = vperm.xlu1 %2913, %v2360_v19  }
  0x46   : > { %983 = vperm.xlu0 %2912, %v2359_v20  }
  0x49   : > { %877 = vperm.xlu1 %2913, %v2353_v21   ;;  %v532_v21 = vlaneseq }
  0x4a   : > { %793 = vperm.xlu0 %2912, %v2348_v22  }
  0x4d   : > { %1070 = vperm.xlu1 %2913, %v2364_v23  }
  0x4e   : > { %1009 = vperm.xlu0 %2912, %v2361_v24   ;;  %v3462_v24 = vand.u32 127, %v532_v21 }
  0x50   : > { %4725 = vst [vmem:[#allocation23_spill] sm:$0xff] %v3462_v24  ;;  %vm547_vm3 = vcmp.lt.s32.totalorder %v3462_v24, 1  ;;  %vm573_vm4 = vcmp.lt.s32.totalorder %v3462_v24, 2  ;;  %vm534_vm5 = vcmp.lt.s32.totalorder %v3462_v24, 127  ;;  %vm560_vm6 = vcmp.lt.s32.totalorder %v3462_v24, 126 }
  0x51   : > { %581 = vperm.xlu1 %2913, %v578_v25  }
  0x52   : > { %1081 = vperm.xlu0 %2912, %v2365_v26  }
  0x55   : > { %1024 = vperm.xlu1 %2913, %v2362_v27  }
  0x56   : > { %592 = vperm.xlu0 %2912, %v2337_v28  }
  0x59   : > { %607 = vperm.xlu1 %2913, %v2338_v29  }
  0x5a   : > { %1096 = vperm.xlu0 %2912, %v2366_v30  }
  0x5d   : > { %691 = vperm.xlu1 %2913, %v2343_v31  }
  0x5e   : > { %680 = vperm.xlu0 %2912, %v2342_v32  }
  0x61   : > { %1111 = vperm.xlu1 %2913, %v2367_v33  }
  0x62   : > { %1039 = vperm.xlu0 %2912, %v2363_v34  }
  0xb4   : > { %v3440_v7 = vpop.permute.xlu1 %821 }
  0xb5   : > { %v3342_v35 = vpop.permute.xlu0 %737 }
  0xb8   : > { %v3442_v8 = vpop.permute.xlu1 %832 }
  0xb9   : > { %v3344_v36 = vpop.permute.xlu0 %748 }
  0xbc   : > { %v848_v9 = vpop.permute.xlu1 %847 }
  0xbd   : > { %v3346_v37 = vpop.permute.xlu0 %763 }
  0xc0   : > { %v3444_v10 = vpop.permute.xlu1 %862 }
  0xc1   : > { %v3348_v38 = vpop.permute.xlu0 %778 }
  0xc4   : > { %v3446_v11 = vpop.permute.xlu1 %994 }
  0xc5   : > { %v3350_v39 = vpop.permute.xlu0 %983 }
  0xc8   : > { %v3448_v12 = vpop.permute.xlu1 %877 }
  0xc9   : > { %v3352_v40 = vpop.permute.xlu0 %793 }
  0xcc   : > { %v3450_v13 = vpop.permute.xlu1 %1070 }
  0xcd   : > { %v1010_v41 = vpop.permute.xlu0 %1009 }
  0xd0   : > { %v582_v14 = vpop.permute.xlu1 %581 }
  0xd1   : > { %v3354_v42 = vpop.permute.xlu0 %1081 }
  0xd2   : > { %4714 = vst [vmem:[#allocation12_spill] sm:$0xff] %v3354_v42 }
  0xd4   : > { %v3452_v15 = vpop.permute.xlu1 %1024 }
  0xd5   : > { %v3356_v43 = vpop.permute.xlu0 %592 }
  0xd8   : > { %v3454_v16 = vpop.permute.xlu1 %607 }
  0xd9   : > { %v1097_v44 = vpop.permute.xlu0 %1096 }
  0xdc   : > { %v692_v18 = vpop.permute.xlu1 %691 }
  0xdd   : > { %v681_v17 = vpop.permute.xlu0 %680 }
  0xe0   : > { %v3458_v20 = vpop.permute.xlu1 %1111 }
  0xe1   : > { %v3456_v19 = vpop.permute.xlu0 %1039  ;;  %4724 = vst [vmem:[#allocation22_spill] sm:$0xff] %v3458_v20 }
 0x10a   : > { %v3358_v45 = vpop.f32.mrb[0].mxu0  ;;  %v3360_v46 = vpop.f32.mrb[0].mxu1 }
 0x10b   : > { %4715 = vst [vmem:[#allocation13_spill] sm:$0xff] %v3358_v45  ;;  %4716 = vst [vmem:[#allocation14_spill] sm:$0xff] %v3360_v46  ;;  %524 = vrot.lane.b32.xlu1 %v3358_v45, %s3100_s15  ;;  %539 = vrot.lane.b32.xlu0 %v3358_v45, %s3101_s30  ;;  %v3365_v47 = vpop.f32.mrb[1].mxu0  ;;  %v3367_v48 = vpop.f32.mrb[1].mxu1  ;;  %v3373_v53 = vmul.f32 %v1010_v41, %v3358_v45  ;;  %v3379_v55 = vmul.f32 %v1010_v41, %v3360_v46 }
 0x10c   : > { %4717 = vst [vmem:[#allocation15_spill] sm:$0xff] %v3365_v47  ;;  %4718 = vst [vmem:[#allocation16_spill] sm:$0xff] %v3367_v48  ;;  %v480_v49 = vpop.f32.mrb[2].mxu0  ;;  %v521_v50 = vpop.f32.mrb[2].mxu1  ;;  %v3376_v54 = vmul.f32 %v1010_v41, %v3365_v47  ;;  %v3382_v56 = vmul.f32 %v1010_v41, %v3367_v48  ;;  %v3385_v57 = vmul.f32 %v1097_v44, %v3358_v45 }
 0x10d   : > { %v481_v51 = vpop.f32.mrb[3].mxu0  ;;  %v522_v52 = vpop.f32.mrb[3].mxu1  ;;  %v3388_v58 = vmul.f32 %v1097_v44, %v3365_v47  ;;  %v3391_v59 = vmul.f32 %v1097_v44, %v3360_v46  ;;  %v3394_v60 = vmul.f32 %v1097_v44, %v3367_v48  ;;  %v595_v27 = vmul.f32 %v3356_v43, %v3358_v45 }
 0x10e   : > { %4719 = vst [vmem:[#allocation17_spill] sm:$0xff] %v3382_v56  ;;  %4720 = vst [vmem:[#allocation18_spill] sm:$0xff] %v3385_v57  ;;  %v596_v30 = vmul.f32 %v3356_v43, %v3365_v47  ;;  %v597_v31 = vmul.f32 %v3356_v43, %v3360_v46  ;;  %v598_v32 = vmul.f32 %v3356_v43, %v3367_v48 }
 0x10f   : > { %528 = vrot.lane.b32.xlu1 %v3360_v46, %s3100_s15  ;;  %543 = vrot.lane.b32.xlu0 %v3360_v46, %s3101_s30  ;;  %4721 = vst [vmem:[#allocation19_spill] sm:$0xff] %v3388_v58  ;;  %4722 = vst [vmem:[#allocation20_spill] sm:$0xff] %v3391_v59  ;;  %v694_v33 = vmul.f32 %v692_v18, %v3358_v45  ;;  %v695_v44 = vmul.f32 %v692_v18, %v3365_v47 }
 0x110   : > { %4723 = vst [vmem:[#allocation21_spill] sm:$0xff] %v3394_v60  ;;  %v696_v49 = vmul.f32 %v692_v18, %v3360_v46  ;;  %v697_v50 = vmul.f32 %v692_v18, %v3367_v48  ;;  %v3492_v43 = vmul.f32 %v3346_v37, %v3358_v45  ;;  %v3496_v51 = vmul.f32 %v3346_v37, %v3365_v47 }
 0x111   : > { %v3525_v18 = vmul.f32 %v848_v9, %v3360_v46  ;;  %v3528_v21 = vmul.f32 %v848_v9, %v3367_v48 }
 0x113   : > { %565 = vrot.lane.b32.xlu0 %v3358_v45, %s3102_s0  ;;  %541 = vrot.lane.b32.xlu1 %v3365_v47, %s3101_s30  ;;  %4729 = vst [vmem:[#allocation27_spill] sm:$0xff] %v3528_v21 }
 0x117   : > { %569 = vrot.lane.b32.xlu0 %v3360_v46, %s3102_s0  ;;  %545 = vrot.lane.b32.xlu1 %v3367_v48, %s3101_s30 }
 0x11b   : > { %552 = vrot.lane.b32.xlu0 %v3358_v45, %s3103_s16  ;;  %567 = vrot.lane.b32.xlu1 %v3365_v47, %s3102_s0 }
 0x11f   : > { %556 = vrot.lane.b32.xlu0 %v3360_v46, %s3103_s16  ;;  %571 = vrot.lane.b32.xlu1 %v3367_v48, %s3102_s0 }
 0x123   : > { %526 = vrot.lane.b32.xlu0 %v3365_v47, %s3100_s15  ;;  %554 = vrot.lane.b32.xlu1 %v3365_v47, %s3103_s16 }
 0x127   : > { %530 = vrot.lane.b32.xlu0 %v3367_v48, %s3100_s15  ;;  %558 = vrot.lane.b32.xlu1 %v3367_v48, %s3103_s16 }
 0x12b   : > { %706 = vperm.xlu0 %2912, %v2344_v61   ;;  %1126 = vperm.xlu1 %2913, %v2368_v62   ;;  %v3502_v62 = vmul.f32 %v3346_v37, %v3360_v46 }
 0x12f   : > { %908 = vperm.xlu0 %2912, %v2354_v63   ;;  %919 = vperm.xlu1 %2913, %v2355_v0   ;;  %v3506_v63 = vmul.f32 %v3346_v37, %v3367_v48 }
 0x133   : > { %934 = vperm.xlu0 %2912, %v2356_v1   ;;  %949 = vperm.xlu1 %2913, %v2357_v2  }
 0x137   : > { %635 = vperm.xlu0 %2912, %v2339_v3   ;;  %646 = vperm.xlu1 %2913, %v2340_v4   ;;  %v3511_v4 = vmul.f32 %v848_v9, %v3358_v45 }
 0x13b   : > { %964 = vperm.xlu0 %2912, %v2358_v5   ;;  %661 = vperm.xlu1 %2913, %v2341_v6   ;;  %v3514_v5 = vmul.f32 %v848_v9, %v3365_v47 }
 0x17d   : > { %v3460_v22 = vpop.permute.xlu1 %524  ;;  %v540_v23 = vpop.permute.xlu0 %539 }
 0x181   : > { %v3464_v25 = vpop.permute.xlu1 %528  ;;  %v544_v26 = vpop.permute.xlu0 %543 }
 0x185   : > { %v3469_v28 = vpop.permute.xlu0 %565  ;;  %v542_v29 = vpop.permute.xlu1 %541 }
 0x186   : > { %v3480_v34 = vsel %vm547_vm3, %v542_v29, %v544_v26  ;;  %v3484_v41 = vsel %vm547_vm3, %v540_v23, %v542_v29 }
 0x187   : > { %4726 = vst [vmem:[#allocation24_spill] sm:$0xff] %v3480_v34  ;;  %4727 = vst [vmem:[#allocation25_spill] sm:$0xff] %v3484_v41  ;;  %v585_v52 = vmul.f32 %v582_v14, %v3484_v41  ;;  %v586_v61 = vmul.f32 %v582_v14, %v3480_v34  ;;  %v684_v2 = vmul.f32 %v681_v17, %v3484_v41 }
 0x188   : > { %v685_v3 = vmul.f32 %v681_v17, %v3480_v34  ;;  %v752_v29 = vmul.f32 %v3344_v36, %v3484_v41  ;;  %v753_v60 = vmul.f32 %v3344_v36, %v3480_v34  ;;  %v837_v9 = vmul.f32 %v3442_v8, %v3480_v34 }
 0x189   : > { %v570_v0 = vpop.permute.xlu0 %569  ;;  %v546_v1 = vpop.permute.xlu1 %545  ;;  %v3538_v59 = vadd.f32 %v597_v31, %v586_v61  ;;  %v3546_v45 = vadd.f32 %v695_v44, %v684_v2  ;;  %v998_v31 = vmul.f32 %v3446_v11, %v3484_v41 }
 0x18a   : > { %v3518_v6 = vsel %vm547_vm3, %v544_v26, %v546_v1  ;;  %v3522_v37 = vsel %vm547_vm3, %v546_v1, %v540_v23  ;;  %v836_v26 = vmul.f32 %v3442_v8, %v3484_v41  ;;  %v600_v1 = vadd.f32 %v596_v30, %v585_v52 }
 0x18b   : > { %4728 = vst [vmem:[#allocation26_spill] sm:$0xff] %v3522_v37  ;;  %v584_v23 = vmul.f32 %v582_v14, %v3522_v37  ;;  %v587_v46 = vmul.f32 %v582_v14, %v3518_v6  ;;  %v683_v47 = vmul.f32 %v681_v17, %v3522_v37  ;;  %4730 = vst [vmem:[#allocation28_spill] sm:$0xff] %v3546_v45 }
 0x18c   : > { %v3548_v58 = vadd.f32 %v696_v49, %v685_v3  ;;  %v999_v14 = vmul.f32 %v3446_v11, %v3480_v34  ;;  %v686_v44 = vmul.f32 %v681_v17, %v3518_v6  ;;  %v751_v49 = vmul.f32 %v3344_v36, %v3522_v37 }
 0x18d   : > { %v3542_v21 = vpop.permute.xlu0 %552  ;;  %v568_v48 = vpop.permute.xlu1 %567  ;;  %v754_v52 = vmul.f32 %v3344_v36, %v3518_v6  ;;  %v599_v3 = vadd.f32 %v595_v27, %v584_v23  ;;  %v3577_v34 = vmul.f32 %v3442_v8, %v3518_v6  ;;  %v602_v41 = vadd.f32 %v598_v32, %v587_v46 }
 0x18e   : > { %4731 = vst [vmem:[#allocation29_spill] sm:$0xff] %v3548_v58  ;;  %v3552_v57 = vsel %vm573_vm4, %v568_v48, %v570_v0  ;;  %v3557_v30 = vsel %vm573_vm4, %v3469_v28, %v568_v48  ;;  %v835_v48 = vmul.f32 %v3442_v8, %v3522_v37  ;;  %v3583_v20 = vadd.f32 %v694_v33, %v683_v47 }
 0x18f   : > { %v741_v61 = vmul.f32 %v3342_v35, %v3557_v30  ;;  %v742_v2 = vmul.f32 %v3342_v35, %v3552_v57  ;;  %4732 = vst [vmem:[#allocation30_spill] sm:$0xff] %v3577_v34  ;;  %v825_v17 = vmul.f32 %v3440_v7, %v3557_v30  ;;  %v826_v36 = vmul.f32 %v3440_v7, %v3552_v57 }
 0x190   : > { %4733 = vst [vmem:[#allocation31_spill] sm:$0xff] %v3583_v20  ;;  %v987_v56 = vmul.f32 %v3350_v39, %v3557_v30  ;;  %v988_v27 = vmul.f32 %v3350_v39, %v3552_v57  ;;  %v3600_v47 = vadd.f32 %v697_v50, %v686_v44  ;;  %v3604_v32 = vmul.f32 %v3446_v11, %v3522_v37 }
 0x191   : > { %v557_v58 = vpop.permute.xlu0 %556  ;;  %v572_v45 = vpop.permute.xlu1 %571  ;;  %v3608_v33 = vmul.f32 %v3446_v11, %v3518_v6  ;;  %v757_v20 = vadd.f32 %v753_v60, %v742_v2  ;;  %v3618_v50 = vmul.f32 %v3450_v13, %v3552_v57  ;;  %v840_v42 = vadd.f32 %v836_v26, %v825_v17 }
 0x192   : > { %v3591_v8 = vsel %vm573_vm4, %v570_v0, %v572_v45  ;;  %v3596_v23 = vsel %vm573_vm4, %v572_v45, %v3469_v28  ;;  %4734 = vst [vmem:[#allocation32_spill] sm:$0xff] %v3600_v47  ;;  %v3612_v0 = vmul.f32 %v3450_v13, %v3557_v30  ;;  %v756_v28 = vadd.f32 %v752_v29, %v741_v61 }
 0x193   : > { %v740_v46 = vmul.f32 %v3342_v35, %v3596_v23  ;;  %v743_v45 = vmul.f32 %v3342_v35, %v3591_v8  ;;  %v3620_v37 = vadd.f32 %v837_v9, %v826_v36  ;;  %v1002_v60 = vadd.f32 %v998_v31, %v987_v56 }
 0x194   : > { %v3632_v29 = vadd.f32 %v999_v14, %v988_v27  ;;  %v824_v61 = vmul.f32 %v3440_v7, %v3596_v23  ;;  %v3638_v26 = vmul.f32 %v3440_v7, %v3591_v8  ;;  %v986_v2 = vmul.f32 %v3350_v39, %v3596_v23 }
 0x195   : > { %v527_v44 = vpop.permute.xlu0 %526  ;;  %v555_v47 = vpop.permute.xlu1 %554  ;;  %v755_v34 = vadd.f32 %v751_v49, %v740_v46  ;;  %v771_v56 = vadd.f32 %v3496_v51, %v756_v28  ;;  %v772_v31 = vadd.f32 %v3502_v62, %v757_v20  ;;  %v758_v14 = vadd.f32 %v754_v52, %v743_v45 }
 0x196   : > { %v3625_v11 = vsel %vm534_vm5, %v527_v44, %v3464_v25  ;;  %v3630_v35 = vsel %vm534_vm5, %v3460_v22, %v527_v44  ;;  %v3654_v44 = vsel %vm560_vm6, %v3542_v21, %v555_v47 }
 0x197   : > { %v610_v9 = vmul.f32 %v3454_v16, %v3630_v35  ;;  %v611_v49 = vmul.f32 %v3454_v16, %v3625_v11  ;;  %v770_v7 = vadd.f32 %v3492_v43, %v755_v34  ;;  %v781_v46 = vmul.f32 %v3348_v38, %v3630_v35 }
 0x198   : > { %v782_v34 = vmul.f32 %v3348_v38, %v3625_v11 }
 0x199   : > { %v531_v17 = vpop.permute.xlu0 %530  ;;  %v614_v36 = vadd.f32 %v610_v9, %v599_v3  ;;  %v615_v27 = vadd.f32 %v611_v49, %v600_v1  ;;  %v559_v62 = vpop.permute.xlu1 %558  ;;  %v839_v1 = vadd.f32 %v835_v48, %v824_v61  ;;  %v773_v3 = vadd.f32 %v3506_v63, %v758_v14 }
 0x19a   : > { %v3659_v51 = vsel %vm534_vm5, %v3464_v25, %v531_v17  ;;  %v3664_v20 = vsel %vm534_vm5, %v531_v17, %v3460_v22  ;;  %v3676_v22 = vsel %vm560_vm6, %v555_v47, %v557_v58  ;;  %v3685_v28 = vsel %vm560_vm6, %v557_v58, %v559_v62 }
 0x19b   : > { %618 = vrot.lane.b32.xlu0 %v614_v36, %s3104_s1  ;;  %620 = vrot.lane.b32.xlu1 %v615_v27, %s3104_s1  ;;  %v612_v43 = vmul.f32 %v3454_v16, %v3659_v51  ;;  %v613_v25 = vmul.f32 %v3454_v16, %v3664_v20  ;;  %v783_v52 = vmul.f32 %v3348_v38, %v3659_v51 }
 0x19c   : > { %v784_v45 = vmul.f32 %v3348_v38, %v3664_v20  ;;  %v785_v48 = vadd.f32 %v781_v46, %v770_v7  ;;  %v3691_v47 = vsel %vm560_vm6, %v559_v62, %v3542_v21  ;;  %v796_v61 = vmul.f32 %v3352_v40, %v3654_v44 }
 0x19d   : > { %v616_v9 = vadd.f32 %v612_v43, %v3538_v59  ;;  %v617_v16 = vadd.f32 %v613_v25, %v602_v41  ;;  %v786_v63 = vadd.f32 %v782_v34, %v771_v56  ;;  %v787_v49 = vadd.f32 %v783_v52, %v772_v31 }
 0x19e   : > { %v788_v38 = vadd.f32 %v784_v45, %v773_v3  ;;  %v854_v58 = vadd.f32 %v3511_v4, %v839_v1  ;;  %v865_v59 = vmul.f32 %v3444_v10, %v3630_v35  ;;  %v989_v41 = vmul.f32 %v3350_v39, %v3591_v8 }
 0x19f   : > { %622 = vrot.lane.b32.xlu0 %v616_v9, %s3104_s1  ;;  %624 = vrot.lane.b32.xlu1 %v617_v16, %s3104_s1  ;;  %v797_v21 = vmul.f32 %v3352_v40, %v3676_v22  ;;  %v798_v56 = vmul.f32 %v3352_v40, %v3685_v28  ;;  %v866_v31 = vmul.f32 %v3444_v10, %v3625_v11 }
 0x1a0   : > { %v1073_v14 = vmul.f32 %v3450_v13, %v3596_v23  ;;  %v3712_v4 = vmul.f32 %v3450_v13, %v3591_v8  ;;  %v3714_v17 = vadd.f32 %v796_v61, %v785_v48  ;;  %v799_v39 = vmul.f32 %v3352_v40, %v3691_v47 }
 0x1a1   : > { %v3718_v36 = vadd.f32 %v797_v21, %v786_v63  ;;  %v3720_v27 = vadd.f32 %v798_v56, %v787_v49  ;;  %v880_v7 = vmul.f32 %v3448_v12, %v3654_v44  ;;  %v855_v46 = vadd.f32 %v3514_v5, %v840_v42  ;;  %v4736_v63 = vld [vmem:[#allocation26_spill] sm:$0xff]  ;;  %v4737_v49 = vld [vmem:[#allocation12_spill] sm:$0xff] }
 0x1a2   : > { %v3725_v62 = vadd.f32 %v799_v39, %v788_v38  ;;  %v869_v34 = vadd.f32 %v865_v59, %v854_v58  ;;  %v1001_v13 = vadd.f32 %v3604_v32, %v986_v2  ;;  %v1027_v43 = vmul.f32 %v3452_v15, %v3630_v35 }
 0x1a3   : > { %v3730_v25 = vadd.f32 %v866_v31, %v855_v46  ;;  %v3734_v40 = vmul.f32 %v3448_v12, %v3676_v22  ;;  %v1017_v1 = vadd.f32 %v3376_v54, %v1002_v60  ;;  %v1028_v52 = vmul.f32 %v3452_v15, %v3625_v11 }
 0x1a4   : > { %v3741_v42 = vadd.f32 %v3525_v18, %v3620_v37  ;;  %v3745_v5 = vmul.f32 %v3444_v10, %v3659_v51  ;;  %v3749_v32 = vmul.f32 %v3448_v12, %v3685_v28  ;;  %v1016_v2 = vadd.f32 %v3373_v53, %v1001_v13 }
 0x1a5   : > { %v1032_v3 = vadd.f32 %v1028_v52, %v1017_v1  ;;  %v1043_v54 = vmul.f32 %v3456_v19, %v3676_v22  ;;  %v1018_v60 = vadd.f32 %v3379_v55, %v3632_v29  ;;  %v1029_v37 = vmul.f32 %v3452_v15, %v3659_v51  ;;  %v4738_v29 = vld [vmem:[#allocation30_spill] sm:$0xff]  ;;  %v4743_v52 = vld [vmem:[#allocation25_spill] sm:$0xff] }
 0x1a6   : > { %v3758_v18 = vadd.f32 %v880_v7, %v869_v34  ;;  %v1031_v45 = vadd.f32 %v1027_v43, %v1016_v2  ;;  %v1042_v9 = vmul.f32 %v3456_v19, %v3654_v44  ;;  %v1044_v16 = vmul.f32 %v3456_v19, %v3685_v28  ;;  %v4741_v34 = vld [vmem:[#allocation17_spill] sm:$0xff]  ;;  %v4742_v43 = vld [vmem:[#allocation22_spill] sm:$0xff] }
 0x1a7   : > { %v3764_v53 = vadd.f32 %v1043_v54, %v1032_v3  ;;  %v1033_v48 = vadd.f32 %v1029_v37, %v1018_v60  ;;  %v1004_v61 = vadd.f32 %v3608_v33, %v989_v41  ;;  %v1084_v55 = vmul.f32 %v4737_v49, %v4736_v63  ;;  %v4745_v3 = vld [vmem:[#allocation28_spill] sm:$0xff]  ;;  %v4746_v60 = vld [vmem:[#allocation29_spill] sm:$0xff] }
 0x1a8   : > { %v3771_v38 = vadd.f32 %v4738_v29, %v3638_v26  ;;  %v3775_v58 = vmul.f32 %v3444_v10, %v3664_v20  ;;  %v3779_v59 = vmul.f32 %v3448_v12, %v3691_v47  ;;  %v3781_v21 = vadd.f32 %v1042_v9, %v1031_v45  ;;  %v4747_v45 = vld [vmem:[#allocation24_spill] sm:$0xff] }
 0x1a9   : > { %4735 = vst [vmem:[#allocation33_spill] sm:$0xff] %v3764_v53  ;;  %v3785_v33 = vadd.f32 %v1044_v16, %v1033_v48  ;;  %v1030_v41 = vmul.f32 %v3452_v15, %v3664_v20  ;;  %v1045_v26 = vmul.f32 %v3456_v19, %v3691_v47  ;;  %v1088_v39 = vadd.f32 %v1084_v55, %v1073_v14  ;;  %v4744_v14 = vld [vmem:[#allocation31_spill] sm:$0xff]  ;;  %v4753_v53 = vld [vmem:[#allocation14_spill] sm:$0xff] }
 0x1aa   : > { %v707_v56 = vpop.permute.xlu0 %706  ;;  %v3783_v31 = vpop.permute.xlu1 %1126  ;;  %v1019_v13 = vadd.f32 %v4741_v34, %v1004_v61  ;;  %v1114_v1 = vmul.f32 %v4742_v43, %v3630_v35  ;;  %v1085_v15 = vmul.f32 %v4737_v49, %v4743_v52  ;;  %v1115_v19 = vmul.f32 %v4742_v43, %v3625_v11  ;;  %v4748_v61 = vld [vmem:[#allocation32_spill] sm:$0xff] }
 0x1ab   : > { %4739 = vst [vmem:[#allocation26_spill] sm:$0xff] %v3783_v31  ;;  %4740 = vst [vmem:[#allocation12_spill] sm:$0xff] %v3785_v33  ;;  %v709_v10 = vmul.f32 %v707_v56, %v3630_v35  ;;  %v710_v7 = vmul.f32 %v707_v56, %v3625_v11  ;;  %v711_v12 = vmul.f32 %v707_v56, %v3659_v51  ;;  %v4752_v31 = vld [vmem:[#allocation15_spill] sm:$0xff] }
 0x1ac   : > { %v712_v46 = vmul.f32 %v707_v56, %v3664_v20  ;;  %v1086_v9 = vmul.f32 %v4737_v49, %v4747_v45  ;;  %v1034_v29 = vadd.f32 %v1030_v41, %v1019_v13  ;;  %v4749_v56 = vld [vmem:[#allocation18_spill] sm:$0xff]  ;;  %v1089_v24 = vadd.f32 %v1085_v15, %v3612_v0 }
 0x1ad   : > { %v713_v2 = vadd.f32 %v709_v10, %v4744_v14  ;;  %v714_v54 = vadd.f32 %v710_v7, %v4745_v3  ;;  %v715_v37 = vadd.f32 %v711_v12, %v4746_v60  ;;  %v1103_v34 = vadd.f32 %v4749_v56, %v1088_v39 }
 0x1ae   : > { %v909_v16 = vpop.permute.xlu0 %908  ;;  %v920_v48 = vpop.permute.xlu1 %919  ;;  %v716_v55 = vadd.f32 %v712_v46, %v4748_v61  ;;  %v4751_v61 = vld [vmem:[#allocation13_spill] sm:$0xff] }
 0x1af   : > { %v911_v33 = vmul.f32 %v909_v16, %v3596_v23  ;;  %v912_v10 = vmul.f32 %v909_v16, %v3557_v30  ;;  %v913_v7 = vmul.f32 %v909_v16, %v3552_v57  ;;  %v914_v12 = vmul.f32 %v909_v16, %v3591_v8  ;;  %717 = vrot.lane.b32.xlu0 %v713_v2, %s3105_s25  ;;  %v4750_v57 = vld [vmem:[#allocation19_spill] sm:$0xff] }
 0x1b0   : > { %v922_v14 = vmul.f32 %v920_v48, %v4736_v63  ;;  %v923_v46 = vmul.f32 %v920_v48, %v4743_v52  ;;  %v924_v41 = vmul.f32 %v920_v48, %v4747_v45  ;;  %v925_v39 = vmul.f32 %v920_v48, %v3518_v6  ;;  %719 = vrot.lane.b32.xlu1 %v714_v54, %s3105_s25 }
 0x1b1   : > { %v3820_v23 = vadd.f32 %v1045_v26, %v1034_v29  ;;  %v3822_v30 = vadd.f32 %v1114_v1, %v1103_v34  ;;  %v1104_v0 = vadd.f32 %v4750_v57, %v1089_v24  ;;  %v1090_v8 = vadd.f32 %v1086_v9, %v3618_v50  ;;  %v4754_v26 = vld [vmem:[#allocation16_spill] sm:$0xff] }
 0x1b2   : > { %v926_v13 = vadd.f32 %v922_v14, %v911_v33  ;;  %v927_v15 = vadd.f32 %v923_v46, %v912_v10  ;;  %v928_v2 = vadd.f32 %v924_v41, %v913_v7  ;;  %v929_v3 = vadd.f32 %v925_v39, %v914_v12  ;;  %v935_v60 = vpop.permute.xlu0 %934  ;;  %v950_v16 = vpop.permute.xlu1 %949 }
 0x1b3   : > { %v937_v56 = vmul.f32 %v935_v60, %v4751_v61  ;;  %v938_v48 = vmul.f32 %v935_v60, %v4752_v31  ;;  %v939_v54 = vmul.f32 %v935_v60, %v4753_v53  ;;  %v940_v29 = vmul.f32 %v935_v60, %v4754_v26  ;;  %721 = vrot.lane.b32.xlu0 %v715_v37, %s3105_s25  ;;  %v4755_v37 = vld [vmem:[#allocation27_spill] sm:$0xff] }
 0x1b4   : > { %v952_v24 = vmul.f32 %v950_v16, %v3630_v35  ;;  %v953_v50 = vmul.f32 %v950_v16, %v3625_v11  ;;  %v954_v33 = vmul.f32 %v950_v16, %v3659_v51  ;;  %v955_v1 = vmul.f32 %v950_v16, %v3664_v20  ;;  %723 = vrot.lane.b32.xlu1 %v716_v55, %s3105_s25 }
 0x1b5   : > { %v941_v9 = vadd.f32 %v937_v56, %v926_v13  ;;  %v942_v34 = vadd.f32 %v938_v48, %v927_v15  ;;  %v943_v10 = vadd.f32 %v939_v54, %v928_v2  ;;  %v944_v7 = vadd.f32 %v940_v29, %v929_v3  ;;  %v4757_v29 = vld [vmem:[#allocation21_spill] sm:$0xff] }
 0x1b6   : > { %v636_v12 = vpop.permute.xlu0 %635  ;;  %v647_v14 = vpop.permute.xlu1 %646  ;;  %v871_v46 = vadd.f32 %v3745_v5, %v3741_v42  ;;  %v857_v41 = vadd.f32 %v4755_v37, %v3771_v38  ;;  %v3840_v39 = vadd.f32 %v1115_v19, %v1104_v0  ;;  %v1116_v57 = vmul.f32 %v4742_v43, %v3659_v51  ;;  %v4756_v42 = vld [vmem:[#allocation20_spill] sm:$0xff] }
 0x1b7   : > { %v956_v60 = vadd.f32 %v952_v24, %v941_v9  ;;  %v957_v16 = vadd.f32 %v953_v50, %v942_v34  ;;  %v958_v55 = vadd.f32 %v954_v33, %v943_v10  ;;  %v959_v13 = vadd.f32 %v955_v1, %v944_v7  ;;  %804 = vrot.lane.b32.xlu0 %v3714_v17, %s3106_s26 }
 0x1b8   : > { %v638_v15 = vmul.f32 %v636_v12, %v4736_v63  ;;  %v639_v2 = vmul.f32 %v636_v12, %v4743_v52  ;;  %806 = vrot.lane.b32.xlu1 %v3718_v36, %s3106_s26  ;;  %v1105_v5 = vadd.f32 %v4756_v42, %v1090_v8  ;;  %v1087_v38 = vmul.f32 %v4737_v49, %v3518_v6 }
 0x1b9   : > { %v640_v19 = vmul.f32 %v636_v12, %v4747_v45  ;;  %v641_v0 = vmul.f32 %v636_v12, %v3518_v6  ;;  %v650_v3 = vmul.f32 %v647_v14, %v4752_v31  ;;  %v651_v56 = vmul.f32 %v647_v14, %v4753_v53  ;;  %v4759_v12 = vld [vmem:[#allocation26_spill] sm:$0xff] }
 0x1ba   : > { %v649_v17 = vmul.f32 %v647_v14, %v4751_v61  ;;  %v652_v63 = vmul.f32 %v647_v14, %v4754_v26  ;;  %v965_v52 = vpop.permute.xlu0 %964  ;;  %v662_v48 = vpop.permute.xlu1 %661  ;;  %v1120_v36 = vadd.f32 %v1116_v57, %v1105_v5  ;;  %v1091_v8 = vadd.f32 %v1087_v38, %v3712_v4 }
 0x1bb   : > { %v967_v54 = vmul.f32 %v965_v52, %v3654_v44  ;;  %v968_v49 = vmul.f32 %v965_v52, %v3676_v22  ;;  %v969_v45 = vmul.f32 %v965_v52, %v3685_v28  ;;  %808 = vrot.lane.b32.xlu0 %v3720_v27, %s3106_s26  ;;  %v1117_v6 = vmul.f32 %v4742_v43, %v3664_v20 }
 0x1bc   : > { %v664_v53 = vmul.f32 %v662_v48, %v3630_v35  ;;  %v665_v31 = vmul.f32 %v662_v48, %v3625_v11  ;;  %v666_v61 = vmul.f32 %v662_v48, %v3659_v51  ;;  %v667_v26 = vmul.f32 %v662_v48, %v3664_v20  ;;  %810 = vrot.lane.b32.xlu1 %v3725_v62, %s3106_s26 }
 0x1bd   : > { %v970_v4 = vmul.f32 %v965_v52, %v3691_v47  ;;  %v1106_v24 = vadd.f32 %v4757_v29, %v1091_v8  ;;  %v654_v50 = vadd.f32 %v650_v3, %v639_v2  ;;  %v655_v33 = vadd.f32 %v651_v56, %v640_v19 }
 0x1be   : > { %v885_v27 = vadd.f32 %v3734_v40, %v3730_v25  ;;  %v872_v43 = vadd.f32 %v3775_v58, %v857_v41  ;;  %v653_v35 = vadd.f32 %v649_v17, %v638_v15  ;;  %v656_v1 = vadd.f32 %v652_v63, %v641_v0 }
 0x1bf   : > { %888 = vrot.lane.b32.xlu0 %v3758_v18, %s3104_s1  ;;  %v1121_v11 = vadd.f32 %v1117_v6, %v1106_v24  ;;  %v669_v51 = vadd.f32 %v665_v31, %v654_v50  ;;  %v670_v20 = vadd.f32 %v666_v61, %v655_v33  ;;  %v3876_v62 = vadd.f32 %v967_v54, %v956_v60  ;;  %v4758_v18 = vld [vmem:[#allocation33_spill] sm:$0xff] }
 0x1c0   : > { %890 = vrot.lane.b32.xlu1 %v885_v27, %s3104_s1  ;;  %v668_v9 = vadd.f32 %v664_v53, %v653_v35  ;;  %v671_v34 = vadd.f32 %v667_v26, %v656_v1  ;;  %v3879_v10 = vadd.f32 %v968_v49, %v957_v16  ;;  %v3881_v7 = vadd.f32 %v969_v45, %v958_v55  ;;  %v4761_v55 = vld [vmem:[#allocation23_spill] sm:$0xff] }
 0x1c1   : > { %v886_v25 = vadd.f32 %v3749_v32, %v871_v46  ;;  %v3884_v40 = vadd.f32 %v970_v4, %v959_v13  ;;  %v887_v58 = vadd.f32 %v3779_v59, %v872_v43  ;;  %v1129_v14 = vmul.f32 %v4759_v12, %v3654_v44  ;;  %v4760_v46 = vld [vmem:[#allocation12_spill] sm:$0xff] }
 0x1c2   : > { %v1130_v32 = vmul.f32 %v4759_v12, %v3676_v22  ;;  %v1131_v59 = vmul.f32 %v4759_v12, %v3685_v28  ;;  %v1132_v37 = vmul.f32 %v4759_v12, %v3691_v47  ;;  %vm626_vm7 = vcmp.lt.s32.totalorder %v4761_v55, 20 }
 0x1c3   : > { %892 = vrot.lane.b32.xlu0 %v886_v25, %s3104_s1  ;;  %vm725_vm8 = vcmp.lt.s32.totalorder %v4761_v55, 108  ;;  %vm812_vm9 = vcmp.lt.s32.totalorder %v4761_v55, 40  ;;  %vm1145_vm10 = vcmp.lt.s32.totalorder %v4761_v55, 88 }
 0x1c4   : > { %894 = vrot.lane.b32.xlu1 %v887_v58, %s3104_s1  ;;  %v1134_v41 = vadd.f32 %v1130_v32, %v3840_v39  ;;  %v1135_v44 = vadd.f32 %v1131_v59, %v1120_v36  ;;  %v1136_v22 = vadd.f32 %v1132_v37, %v1121_v11 }
 0x1c7   : > { %1050 = vrot.lane.b32.xlu0 %v3781_v21, %s3105_s25  ;;  %v1133_v21 = vadd.f32 %v1129_v14, %v3822_v30 }
 0x1c8   : > { %1052 = vrot.lane.b32.xlu1 %v4758_v18, %s3105_s25 }
 0x1cb   : > { %1054 = vrot.lane.b32.xlu0 %v4760_v46, %s3105_s25 }
 0x1cc   : > { %1056 = vrot.lane.b32.xlu1 %v3820_v23, %s3105_s25 }
 0x1cf   : > { %1137 = vrot.lane.b32.xlu0 %v1133_v21, %s3107_s29 }
 0x1d0   : > { %1139 = vrot.lane.b32.xlu1 %v1134_v41, %s3107_s29 }
 0x1d3   : > { %1141 = vrot.lane.b32.xlu0 %v1135_v44, %s3107_s29 }
 0x1d4   : > { %1143 = vrot.lane.b32.xlu1 %v1136_v22, %s3107_s29 }
 0x20d   : > { %v621_v57 = vpop.permute.xlu1 %620  ;;  %v619_v60 = vpop.permute.xlu0 %618 }
 0x20e   : > { %v629_v30 = vsel %vm626_vm7, %v619_v60, %v621_v57 }
 0x20f   : > { %v673_v38 = vadd.f32 %v669_v51, %v629_v30 }
 0x211   : > { %v625_v23 = vpop.permute.xlu1 %624  ;;  %v623_v16 = vpop.permute.xlu0 %622 }
 0x212   : > { %v630_v28 = vsel %vm626_vm7, %v625_v23, %v619_v60  ;;  %v628_v15 = vsel %vm626_vm7, %v621_v57, %v623_v16  ;;  %v627_v2 = vsel %vm626_vm7, %v623_v16, %v625_v23 }
 0x213   : > { %v672_v39 = vadd.f32 %v668_v9, %v630_v28  ;;  %v674_v0 = vadd.f32 %v670_v20, %v628_v15  ;;  %v675_v3 = vadd.f32 %v671_v34, %v627_v2 }
 0x221   : > { %v718_v47 = vpop.permute.xlu0 %717 }
 0x222   : > { %v720_v13 = vpop.permute.xlu1 %719 }
 0x223   : > { %v728_v42 = vsel %vm725_vm8, %v718_v47, %v720_v13 }
 0x224   : > { %v3919_v5 = vadd.f32 %v728_v42, %v672_v39 }
 0x225   : > { %v722_v19 = vpop.permute.xlu0 %721 }
 0x226   : > { %v2369_v56 = vmul.f32 -1.442695, %v3919_v5  ;;  %v727_v17 = vsel %vm725_vm8, %v720_v13, %v722_v19  ;;  %v724_v63 = vpop.permute.xlu1 %723 }
 0x227   : > { %v3924_v52 = vadd.f32 %v727_v17, %v673_v38  ;;  %v726_v48 = vsel %vm725_vm8, %v722_v19, %v724_v63  ;;  %v729_v36 = vsel %vm725_vm8, %v724_v63, %v718_v47 }
 0x228   : > { %v3930_v8 = vadd.f32 %v726_v48, %v674_v0  ;;  %v3932_v54 = vadd.f32 %v729_v36, %v675_v3  ;;  %2919 = vpow2.f32 %v2369_v56 }
 0x229   : > { %v2370_v49 = vmul.f32 -1.442695, %v3924_v52  ;;  %v805_v45 = vpop.permute.xlu0 %804 }
 0x22a   : > { %v2371_v6 = vmul.f32 -1.442695, %v3930_v8  ;;  %v2372_v53 = vmul.f32 -1.442695, %v3932_v54  ;;  %v807_v31 = vpop.permute.xlu1 %806 }
 0x22b   : > { %2921 = vpow2.f32 %v2370_v49  ;;  %v815_v32 = vsel %vm812_vm9, %v805_v45, %v807_v31 }
 0x22c   : > { %2923 = vpow2.f32 %v2371_v6 }
 0x22d   : > { %v809_v61 = vpop.permute.xlu0 %808  ;;  %2925 = vpow2.f32 %v2372_v53 }
 0x22e   : > { %v811_v26 = vpop.permute.xlu1 %810  ;;  %v814_v21 = vsel %vm812_vm9, %v807_v31, %v809_v61 }
 0x22f   : > { %v816_v20 = vsel %vm812_vm9, %v811_v26, %v805_v45  ;;  %v813_v37 = vsel %vm812_vm9, %v809_v61, %v811_v26 }
 0x231   : > { %v889_v4 = vpop.permute.xlu0 %888 }
 0x232   : > { %v891_v29 = vpop.permute.xlu1 %890  ;;  %v2920_v24 = vpop.eup %2919 }
 0x233   : > { %v1166_v35 = vadd.f32 1.0, %v2920_v24  ;;  %v898_v12 = vsel %vm626_vm7, %v889_v4, %v891_v29 }
 0x234   : > { %v901_v22 = vadd.f32 %v898_v12, %v815_v32 }
 0x235   : > { %v893_v50 = vpop.permute.xlu0 %892  ;;  %v2922_v33 = vpop.eup %2921  ;;  %2927 = vrcp.f32 %v1166_v35 }
 0x236   : > { %v895_v27 = vpop.permute.xlu1 %894  ;;  %v2924_v43 = vpop.eup %2923  ;;  %v1167_v51 = vadd.f32 1.0, %v2922_v33  ;;  %v897_v14 = vsel %vm626_vm7, %v891_v29, %v893_v50 }
 0x237   : > { %v899_v1 = vsel %vm626_vm7, %v895_v27, %v889_v4  ;;  %v2926_v11 = vpop.eup %2925  ;;  %v1168_v34 = vadd.f32 1.0, %v2924_v43  ;;  %v896_v46 = vsel %vm626_vm7, %v893_v50, %v895_v27  ;;  %v902_v57 = vadd.f32 %v897_v14, %v814_v21 }
 0x238   : > { %v900_v25 = vadd.f32 %v899_v1, %v816_v20  ;;  %v1169_v18 = vadd.f32 1.0, %v2926_v11  ;;  %2929 = vrcp.f32 %v1167_v51  ;;  %v903_v23 = vadd.f32 %v896_v46, %v813_v37  ;;  %v1353_v46 = vld [vmem:[%s4678_s9 + $0x80] sm:$0xff] }
 0x239   : > { %v1051_v9 = vpop.permute.xlu0 %1050  ;;  %2931 = vrcp.f32 %v1168_v34  ;;  %v977_v13 = vadd.f32 %v3881_v7, %v902_v57 }
 0x23a   : > { %v1053_v58 = vpop.permute.xlu1 %1052  ;;  %v975_v41 = vadd.f32 %v3876_v62, %v900_v25  ;;  %2933 = vrcp.f32 %v1169_v18  ;;  %v976_v62 = vadd.f32 %v3879_v10, %v901_v22  ;;  %v978_v42 = vadd.f32 %v3884_v40, %v903_v23 }
 0x23b   : > { %v1060_v60 = vsel %vm725_vm8, %v1051_v9, %v1053_v58 }
 0x23c   : > { %v1062_v28 = vadd.f32 %v1060_v60, %v975_v41  ;;  %v1337_v60 = vld [vmem:[%s4678_s9] sm:$0xff] }
 0x23d   : > { %v1055_v59 = vpop.permute.xlu0 %1054 }
 0x23e   : > { %v1057_v44 = vpop.permute.xlu1 %1056  ;;  %v1059_v47 = vsel %vm725_vm8, %v1053_v58, %v1055_v59 }
 0x23f   : > { %v1058_v30 = vsel %vm725_vm8, %v1055_v59, %v1057_v44  ;;  %v1061_v15 = vsel %vm725_vm8, %v1057_v44, %v1051_v9  ;;  %v2928_v19 = vpop.eup %2927  ;;  %v1063_v0 = vadd.f32 %v1059_v47, %v976_v62  ;;  %v1354_v59 = vld [vmem:[%s4678_s9 + $0x88] sm:$0xff] }
 0x240   : > { %v1064_v3 = vadd.f32 %v1058_v30, %v977_v13  ;;  %v1065_v17 = vadd.f32 %v1061_v15, %v978_v42  ;;  %v3991_v57 = vpack.c.bf16 %v1354_v59, %v1353_v46  ;;  %v1369_v13 = vld [vmem:[%s4678_s9 + $0x100] sm:$0xff]  ;;  %v1370_v15 = vld [vmem:[%s4678_s9 + $0x108] sm:$0xff] }
 0x241   : > { %v1138_v16 = vpop.permute.xlu0 %1137  ;;  %v1346_v46 = vld [vmem:[%s4678_s9 + $0x48] sm:$0xff] }
 0x242   : > { %v1140_v39 = vpop.permute.xlu1 %1139  ;;  %v2930_v36 = vpop.eup %2929 }
 0x243   : > { %v1148_v2 = vsel %vm1145_vm10, %v1138_v16, %v1140_v39  ;;  %v2932_v6 = vpop.eup %2931 }
 0x244   : > { %v1150_v38 = vadd.f32 %v1148_v2, %v1062_v28  ;;  %v2934_v61 = vpop.eup %2933  ;;  %v1356_v28 = vld [vmem:[%s4678_s9 + $0x98] sm:$0xff] }
 0x245   : > { %v1142_v56 = vpop.permute.xlu0 %1141 }
 0x246   : > { %v1178_v63 = vmul.f32 %v2928_v19, %v1150_v38  ;;  %v2373_v48 = vmul.f32 -1.442695, %v1150_v38  ;;  %v1147_v10 = vsel %vm1145_vm10, %v1140_v39, %v1142_v56  ;;  %v1144_v7 = vpop.permute.xlu1 %1143  ;;  %v2918_v39 = vld [vmem:[%s4673_s4] sm:$0xff]   ;;  %v1387_v38 = vld [vmem:[%s4678_s9 + $0x190] sm:$0xff]  ;;  %v1388_v19 = vld [vmem:[%s4678_s9 + $0x198] sm:$0xff] }
 0x247   : > { %v1151_v49 = vadd.f32 %v1147_v10, %v1063_v0  ;;  %v1146_v45 = vsel %vm1145_vm10, %v1142_v56, %v1144_v7  ;;  %v1149_v40 = vsel %vm1145_vm10, %v1144_v7, %v1138_v16  ;;  %v1355_v16 = vld [vmem:[%s4678_s9 + $0x90] sm:$0xff]  ;;  %v1340_v56 = vld [vmem:[%s4678_s9 + $0x18] sm:$0xff]  ;;  %v4047_v10 = vpack.c.bf16 %v1388_v19, %v1387_v38  ;;  %v1398_v38 = vld [vmem:[%s4678_s9 + $0x1e8] sm:$0xff] }
 0x248   : > { %2935 = vpow2.f32 %v2373_v48  ;;  %v1152_v53 = vadd.f32 %v1146_v45, %v1064_v3  ;;  %v1153_v31 = vadd.f32 %v1149_v40, %v1065_v17  ;;  %v4029_v0 = vpack.c.bf16 %v1356_v28, %v1355_v16  ;;  %v1339_v3 = vld [vmem:[%s4678_s9 + $0x10] sm:$0xff]  ;;  %v1358_v48 = vld [vmem:[%s4678_s9 + $0xa8] sm:$0xff]  ;;  %v1389_v45 = vld [vmem:[%s4678_s9 + $0x1a0] sm:$0xff] }
 0x249   : > { %v1179_v26 = vmul.f32 %v2930_v36, %v1151_v49  ;;  %v2374_v4 = vmul.f32 -1.442695, %v1151_v49  ;;  %v4037_v17 = vpack.c.bf16 %v1370_v15, %v1369_v13  ;;  %v1371_v7 = vld [vmem:[%s4678_s9 + $0x110] sm:$0xff]  ;;  %v1372_v36 = vld [vmem:[%s4678_s9 + $0x118] sm:$0xff]  ;;  %v4056_v49 = vpack.c.bf16 %v1340_v56, %v1339_v3  ;;  %v1390_v40 = vld [vmem:[%s4678_s9 + $0x1a8] sm:$0xff] }
 0x24a   : > { %v1180_v29 = vmul.f32 %v2932_v6, %v1152_v53  ;;  %v1181_v24 = vmul.f32 %v2934_v61, %v1153_v31  ;;  %v2375_v50 = vmul.f32 -1.442695, %v1152_v53  ;;  %v2376_v33 = vmul.f32 -1.442695, %v1153_v31  ;;  %v1341_v53 = vld [vmem:[%s4678_s9 + $0x20] sm:$0xff]  ;;  %v1342_v31 = vld [vmem:[%s4678_s9 + $0x28] sm:$0xff] }
 0x24b   : > { %2937 = vpow2.f32 %v2374_v4  ;;  %v4075_v61 = vpack.c.bf16 %v1372_v36, %v1371_v7  ;;  %v1360_v4 = vld [vmem:[%s4678_s9 + $0xb8] sm:$0xff]  ;;  %v1365_v28 = vld [vmem:[%s4678_s9 + $0xe0] sm:$0xff]  ;;  %v1350_v56 = vld [vmem:[%s4678_s9 + $0x68] sm:$0xff] }
 0x24c   : > { %2939 = vpow2.f32 %v2375_v50  ;;  %v1374_v50 = vld [vmem:[%s4678_s9 + $0x128] sm:$0xff]  ;;  %v1380_v13 = vld [vmem:[%s4678_s9 + $0x158] sm:$0xff]  ;;  %v1349_v3 = vld [vmem:[%s4678_s9 + $0x60] sm:$0xff] }
 0x24d   : > { %2941 = vpow2.f32 %v2376_v33  ;;  %v4093_v33 = vpack.c.bf16 %v1342_v31, %v1341_v53  ;;  %v1368_v7 = vld [vmem:[%s4678_s9 + $0xf8] sm:$0xff]  ;;  %v4237_v53 = vpack.c.bf16 %v1350_v56, %v1349_v3  ;;  %v1399_v31 = vld [vmem:[%s4678_s9 + $0x1f0] sm:$0xff] }
 0x252   : > { %v2936_v27 = vpop.eup %2935 }
 0x253   : > { %v1194_v43 = vadd.f32 1.0, %v2936_v27  ;;  %v1391_v27 = vld [vmem:[%s4678_s9 + $0x1b0] sm:$0xff] }
 0x255   : > { %v2938_v35 = vpop.eup %2937  ;;  %2943 = vrcp.f32 %v1194_v43  ;;  %v1392_v43 = vld [vmem:[%s4678_s9 + $0x1b8] sm:$0xff] }
 0x256   : > { %v2940_v55 = vpop.eup %2939  ;;  %v1195_v1 = vadd.f32 1.0, %v2938_v35 }
 0x257   : > { %v2942_v11 = vpop.eup %2941  ;;  %v1196_v51 = vadd.f32 1.0, %v2940_v55  ;;  %v1343_v55 = vld [vmem:[%s4678_s9 + $0x30] sm:$0xff] }
 0x258   : > { %2945 = vrcp.f32 %v1195_v1  ;;  %v1197_v20 = vadd.f32 1.0, %v2942_v11  ;;  %v1344_v1 = vld [vmem:[%s4678_s9 + $0x38] sm:$0xff] }
 0x259   : > { %2947 = vrcp.f32 %v1196_v51  ;;  %v1361_v51 = vld [vmem:[%s4678_s9 + $0xc0] sm:$0xff] }
 0x25a   : > { %2949 = vrcp.f32 %v1197_v20  ;;  %v1362_v20 = vld [vmem:[%s4678_s9 + $0xc8] sm:$0xff] }
 0x25f   : > { %v2944_v9 = vpop.eup %2943 }
 0x260   : > { %v1206_v34 = vmul.f32 %v2944_v9, %v3919_v5  ;;  %v4120_v9 = vpack.c.bf16 %v1392_v43, %v1391_v27 }
 0x262   : > { %v2946_v25 = vpop.eup %2945  ;;  %v1210_v58 = vadd.f32 %v1206_v34, %v1178_v63  ;;  %v1357_v63 = vld [vmem:[%s4678_s9 + $0xa0] sm:$0xff]  ;;  %v1375_v34 = vld [vmem:[%s4678_s9 + $0x130] sm:$0xff] }
 0x263   : > { %v2948_v18 = vpop.eup %2947  ;;  %v1207_v12 = vmul.f32 %v2946_v25, %v3924_v52  ;;  %v1385_v52 = vld [vmem:[%s4678_s9 + $0x180] sm:$0xff]  ;;  %v4066_v6 = vpack.c.bf16 %v1358_v48, %v1357_v63  ;;  %v1376_v25 = vld [vmem:[%s4678_s9 + $0x138] sm:$0xff]  ;;  %v1367_v48 = vld [vmem:[%s4678_s9 + $0xf0] sm:$0xff] }
 0x264   : > { %v2950_v14 = vpop.eup %2949  ;;  %v1208_v32 = vmul.f32 %v2948_v18, %v3930_v8  ;;  %v1216_v5 = vpack.c.bf16 %v1210_v58, %v1210_v58  ;;  %v1386_v8 = vld [vmem:[%s4678_s9 + $0x188] sm:$0xff]  ;;  %v4129_v58 = vpack.c.bf16 %v1344_v1, %v1343_v55  ;;  %v1393_v18 = vld [vmem:[%s4678_s9 + $0x1c0] sm:$0xff]  ;;  %v4147_v59 = vpack.c.bf16 %v1376_v25, %v1375_v34  ;;  %v1383_v55 = vld [vmem:[%s4678_s9 + $0x170] sm:$0xff] }
 0x265   : > { %v1211_v21 = vadd.f32 %v1207_v12, %v1179_v26  ;;  %v1209_v37 = vmul.f32 %v2950_v14, %v3932_v54  ;;  %v1338_v54 = vld [vmem:[%s4678_s9 + $0x8] sm:$0xff]  ;;  %v4010_v62 = vpack.c.bf16 %v1386_v8, %v1385_v52  ;;  %v1359_v26 = vld [vmem:[%s4678_s9 + $0xb0] sm:$0xff]  ;;  %v4138_v14 = vpack.c.bf16 %v1362_v20, %v1361_v51  ;;  %v1384_v1 = vld [vmem:[%s4678_s9 + $0x178] sm:$0xff] }
 0x266   : > { %v1212_v41 = vadd.f32 %v1208_v32, %v1180_v29  ;;  %v1229_v30 = vsel %vm429_vm1, %v1216_v5, 0  ;;  %v4019_v42 = vpack.c.bf16 %v1338_v54, %v1337_v60  ;;  %v4084_v29 = vpack.c.bf16 %v1390_v40, %v1389_v45  ;;  %v1394_v12 = vld [vmem:[%s4678_s9 + $0x1c8] sm:$0xff]  ;;  %v1345_v32 = vld [vmem:[%s4678_s9 + $0x40] sm:$0xff]  ;;  %v1347_v54 = vld [vmem:[%s4678_s9 + $0x50] sm:$0xff] }
 0x267   : > { %v1217_v44 = vpack.c.bf16 %v1211_v21, %v1211_v21  ;;  %v1213_v22 = vadd.f32 %v1209_v37, %v1181_v24  ;;  %v1373_v24 = vld [vmem:[%s4678_s9 + $0x120] sm:$0xff]  ;;  %v4102_v35 = vpack.c.bf16 %v1360_v4, %v1359_v26  ;;  %v1363_v21 = vld [vmem:[%s4678_s9 + $0xd0] sm:$0xff]  ;;  %v1364_v37 = vld [vmem:[%s4678_s9 + $0xd8] sm:$0xff]  ;;  %v4156_v5 = vpack.c.bf16 %v1394_v12, %v1393_v18 }
 0x268   : > { %v1218_v23 = vpack.c.bf16 %v1212_v41, %v1212_v41  ;;  %v4111_v11 = vpack.c.bf16 %v1374_v50, %v1373_v24  ;;  %v1377_v41 = vld [vmem:[%s4678_s9 + $0x140] sm:$0xff]  ;;  %v1378_v52 = vld [vmem:[%s4678_s9 + $0x148] sm:$0xff]  ;;  %v4165_v8 = vpack.c.bf16 %v1346_v46, %v1345_v32  ;;  %v4174_v60 = vpack.c.bf16 %v1364_v37, %v1363_v21  ;;  %v1400_v26 = vld [vmem:[%s4678_s9 + $0x1f8] sm:$0xff] }
 0x269   : > { %v1219_v47 = vpack.c.bf16 %v1213_v22, %v1213_v22  ;;  %2378 = vmatprep.subr.msk.bf16.mxu0 %vm429_vm1, %v1217_v44  ;;  %v1395_v44 = vld [vmem:[%s4678_s9 + $0x1d0] sm:$0xff]  ;;  %v1396_v22 = vld [vmem:[%s4678_s9 + $0x1d8] sm:$0xff]  ;;  %v4183_v16 = vpack.c.bf16 %v1378_v52, %v1377_v41  ;;  %v1381_v45 = vld [vmem:[%s4678_s9 + $0x160] sm:$0xff]  ;;  %v4246_v4 = vpack.c.bf16 %v1368_v7, %v1367_v48  ;;  %v4258_v43 = vpack.c.bf16 %v1400_v26, %v1399_v31 }
 0x26a   : > { %1241 = vmatpush1.bf16.msra.mxu0 %v1229_v30  ;;  %v1235_v2 = vsel %vm429_vm1, %v1218_v23, 0  ;;  %v1348_v23 = vld [vmem:[%s4678_s9 + $0x58] sm:$0xff]  ;;  %v4192_v30 = vpack.c.bf16 %v1396_v22, %v1395_v44  ;;  %v1382_v40 = vld [vmem:[%s4678_s9 + $0x168] sm:$0xff]  ;;  %v1351_v24 = vld [vmem:[%s4678_s9 + $0x70] sm:$0xff]  ;;  %v4271_v20 = vpack.c.bf16 %v1384_v1, %v1383_v55 }
 0x26b   : > { %2380 = vmatprep.subr.msk.bf16.mxu1 %vm429_vm1, %v1219_v47  ;;  %2634 = vmatprep.subr.bf16.mxu0 %v3991_v57  ;;  %v1366_v47 = vld [vmem:[%s4678_s9 + $0xe8] sm:$0xff]  ;;  %v4201_v15 = vpack.c.bf16 %v1348_v23, %v1347_v54  ;;  %v1352_v50 = vld [vmem:[%s4678_s9 + $0x78] sm:$0xff]  ;;  %v4255_v27 = vpack.c.bf16 %v1382_v40, %v1381_v45 }
 0x26c   : > { %1284 = vmatpush1.bf16.msra.mxu1 %v1235_v2  ;;  %v1397_v2 = vld [vmem:[%s4678_s9 + $0x1e0] sm:$0xff]  ;;  %v4210_v19 = vpack.c.bf16 %v1366_v47, %v1365_v28  ;;  %v4267_v51 = vpack.c.bf16 %v1352_v50, %v1351_v24  ;;  %v1402_v54 = vld [vmem:[#allocation3 + $0x8] sm:$0xff]  ;;  %v1559_v45 = vld [vmem:[#allocation4 + $0x8] sm:$0xff] }
 0x26d   : > { %2379 = vmatmul.mubr.msk.bf16.vlgmr.msra.gmra.mrb[4].mxu0 %vm425_vm2, %v2918_v39  ;;  %2666 = vmatprep.subr.bf16.mxu1 %v4010_v62  ;;  %v4228_v36 = vpack.c.bf16 %v1398_v38, %v1397_v2  ;;  %v1558_v2 = vld [vmem:[#allocation4] sm:$0xff] }
 0x26e   : > { %2636 = vmatpush3.bf16.msra.mxu0 %v4019_v42 }
 0x26f   : > { %2381 = vmatmul.mubr.msk.bf16.vlgmr.msra.gmra.mrb[4].mxu1 %vm425_vm2, %v2918_v39  ;;  %2638 = vmatprep.subr.bf16.mxu0 %v4029_v0  ;;  %v1379_v39 = vld [vmem:[%s4678_s9 + $0x150] sm:$0xff] }
 0x270   : > { %2668 = vmatpush3.bf16.msra.mxu1 %v4037_v17  ;;  %v4219_v63 = vpack.c.bf16 %v1380_v13, %v1379_v39 }
 0x271   : > { %2670 = vmatprep.subr.bf16.mxu1 %v4047_v10 }
 0x272   : > { %2640 = vmatpush3.bf16.msra.mxu0 %v4056_v49 }
 0x273   : > { %2642 = vmatprep.subr.bf16.mxu0 %v4066_v6 }
 0x274   : > { %2672 = vmatpush3.bf16.msra.mxu1 %v4075_v61 }
 0x275   : > { %2674 = vmatprep.subr.bf16.mxu1 %v4084_v29 }
 0x276   : > { %2644 = vmatpush3.bf16.msra.mxu0 %v4093_v33 }
 0x277   : > { %2646 = vmatprep.subr.bf16.mxu0 %v4102_v35 }
 0x278   : > { %2676 = vmatpush3.bf16.msra.mxu1 %v4111_v11 }
 0x279   : > { %2678 = vmatprep.subr.bf16.mxu1 %v4120_v9 }
 0x27a   : > { %2648 = vmatpush3.bf16.msra.mxu0 %v4129_v58 }
 0x27b   : > { %2650 = vmatprep.subr.bf16.mxu0 %v4138_v14 }
 0x27c   : > { %2680 = vmatpush3.bf16.msra.mxu1 %v4147_v59 }
 0x27d   : > { %2682 = vmatprep.subr.bf16.mxu1 %v4156_v5 }
 0x27e   : > { %2652 = vmatpush3.bf16.msra.mxu0 %v4165_v8 }
 0x27f   : > { %2654 = vmatprep.subr.bf16.mxu0 %v4174_v60 }
 0x280   : > { %2684 = vmatpush3.bf16.msra.mxu1 %v4183_v16 }
 0x281   : > { %2686 = vmatprep.subr.bf16.mxu1 %v4192_v30 }
 0x282   : > { %2656 = vmatpush3.bf16.msra.mxu0 %v4201_v15 }
 0x283   : > { %2658 = vmatprep.subr.bf16.mxu0 %v4210_v19 }
 0x284   : > { %2688 = vmatpush3.bf16.msra.mxu1 %v4219_v63 }
 0x285   : > { %2690 = vmatprep.subr.bf16.mxu1 %v4228_v36 }
 0x286   : > { %2660 = vmatpush3.bf16.msra.mxu0 %v4237_v53 }
 0x287   : > { %2662 = vmatprep.subr.bf16.mxu0 %v4246_v4 }
 0x288   : > { %2692 = vmatpush3.bf16.msra.mxu1 %v4255_v27 }
 0x289   : > { %2694 = vmatprep.subr.bf16.mxu1 %v4258_v43 }
 0x28a   : > { %2664 = vmatpush3.bf16.msra.mxu0 %v4267_v51 }
 0x28b   : > { %2698 = vmatprep.subr.bf16.mxu0 %v3991_v57 }
 0x28c   : > { %2696 = vmatpush3.bf16.msra.mxu1 %v4271_v20 }
 0x28d   : > { %2730 = vmatprep.subr.bf16.mxu1 %v4010_v62 }
 0x340   : > { %v1274_v34 = vpop.f32.mrb[4].mxu0 }
 0x341   : > { %1329 = vst [vmem:[%s1328_s23] sm:$0xff] %v1274_v34  ;;  %v1276_v25 = vpop.f32.mrb[5].mxu0 }
 0x342   : > { %v1317_v18 = vpop.f32.mrb[4].mxu1  ;;  %1330 = vst [vmem:[%s1328_s23 + $0x8] sm:$0xff] %v1276_v25  ;;  %1467 = vmatprep.mubr.f32.mxu0 %v1276_v25  ;;  %v1278_v12 = vpop.f32.mrb[6].mxu0  ;;  %v1561_v21 = vmul.f32 %v1276_v25, %v1276_v25 }
 0x343   : > { %1331 = vst [vmem:[%s1328_s23 + $0x10] sm:$0xff] %v1317_v18  ;;  %v1319_v32 = vpop.f32.mrb[5].mxu1  ;;  %1468 = vmatmul.mubr.f32.vlgmr.msra.gmra.mrb[8].mxu0 %v1274_v34  ;;  %1333 = vst [vmem:[%s1328_s23 + $0x20] sm:$0xff] %v1278_v12  ;;  %v1280_v46 = vpop.f32.mrb[7].mxu0 }
 0x344   : > { %1332 = vst [vmem:[%s1328_s23 + $0x18] sm:$0xff] %v1319_v32  ;;  %1542 = vmatprep.mubr.f32.mxu1 %v1319_v32  ;;  %2700 = vmatpush3.bf16.msra.mxu0 %v4019_v42  ;;  %v1321_v57 = vpop.f32.mrb[6].mxu1  ;;  %1334 = vst [vmem:[%s1328_s23 + $0x28] sm:$0xff] %v1280_v46  ;;  %v1563_v37 = vmul.f32 %v1319_v32, %v1319_v32  ;;  %v1560_v42 = vmul.f32 %v1274_v34, %v1274_v34 }
 0x345   : > { %1543 = vmatmul.mubr.f32.vlgmr.msra.gmra.mrb[8].mxu1 %v1317_v18  ;;  %1335 = vst [vmem:[%s1328_s23 + $0x30] sm:$0xff] %v1321_v57  ;;  %v1323_v62 = vpop.f32.mrb[7].mxu1  ;;  %1472 = vmatprep.mubr.f32.mxu0 %v1280_v46 }
 0x346   : > { %2732 = vmatpush3.bf16.msra.mxu1 %v4037_v17  ;;  %1336 = vst [vmem:[%s1328_s23 + $0x38] sm:$0xff] %v1323_v62  ;;  %1547 = vmatprep.mubr.f32.mxu1 %v1323_v62  ;;  %v1565_v17 = vmul.f32 %v1280_v46, %v1280_v46 }
 0x347   : > { %2702 = vmatprep.subr.bf16.mxu0 %v4029_v0  ;;  %2734 = vmatprep.subr.bf16.mxu1 %v4047_v10  ;;  %v1562_v0 = vmul.f32 %v1317_v18, %v1317_v18  ;;  %v1567_v10 = vmul.f32 %v1323_v62, %v1323_v62 }
 0x348   : > { %1473 = vmatmul.mubr.f32.gmra.mrb[10].mxu0 %v1278_v12 }
 0x349   : > { %1548 = vmatmul.mubr.f32.gmra.mrb[10].mxu1 %v1321_v57  ;;  %2704 = vmatpush3.bf16.msra.mxu0 %v4056_v49  ;;  %v1564_v49 = vmul.f32 %v1278_v12, %v1278_v12 }
 0x34a   : > { %2736 = vmatpush3.bf16.msra.mxu1 %v4075_v61  ;;  %1632 = vmatprep.mubr.f32.mxu0 %v1561_v21  ;;  %v3108_v61 = vmov 0.0  }
 0x34b   : > { %1707 = vmatprep.mubr.f32.mxu1 %v1563_v37  ;;  %2706 = vmatprep.subr.bf16.mxu0 %v4066_v6  ;;  %v1566_v6 = vmul.f32 %v1321_v57, %v1321_v57  ;;  %1722 = vst [vmem:[%s3256_s27] sm:$0xff] %v3108_v61  ;;  %1723 = vst [vmem:[%s3256_s27 + $0x8] sm:$0xff] %v3108_v61 }
 0x34c   : > { %2738 = vmatprep.subr.bf16.mxu1 %v4084_v29 }
 0x34d   : > { %2708 = vmatpush3.bf16.msra.mxu0 %v4093_v33 }
 0x34e   : > { %2740 = vmatpush3.bf16.msra.mxu1 %v4111_v11  ;;  %2710 = vmatprep.subr.bf16.mxu0 %v4102_v35 }
 0x34f   : > { %2742 = vmatprep.subr.bf16.mxu1 %v4120_v9 }
 0x351   : > { %2712 = vmatpush3.bf16.msra.mxu0 %v4129_v58 }
 0x352   : > { %2744 = vmatpush3.bf16.msra.mxu1 %v4147_v59  ;;  %2714 = vmatprep.subr.bf16.mxu0 %v4138_v14  ;;  %v1401_v14 = vld [vmem:[#allocation3] sm:$0xff] }
 0x353   : > { %2746 = vmatprep.subr.bf16.mxu1 %v4156_v5 }
 0x355   : > { %2716 = vmatpush3.bf16.msra.mxu0 %v4165_v8 }
 0x356   : > { %2748 = vmatpush3.bf16.msra.mxu1 %v4183_v16  ;;  %2718 = vmatprep.subr.bf16.mxu0 %v4174_v60 }
 0x357   : > { %2750 = vmatprep.subr.bf16.mxu1 %v4192_v30 }
 0x359   : > { %2720 = vmatpush3.bf16.msra.mxu0 %v4201_v15 }
 0x35a   : > { %2752 = vmatpush3.bf16.msra.mxu1 %v4219_v63  ;;  %2722 = vmatprep.subr.bf16.mxu0 %v4210_v19 }
 0x35b   : > { %2754 = vmatprep.subr.bf16.mxu1 %v4228_v36 }
 0x35d   : > { %2724 = vmatpush3.bf16.msra.mxu0 %v4237_v53 }
 0x35e   : > { %2756 = vmatpush3.bf16.msra.mxu1 %v4255_v27  ;;  %2726 = vmatprep.subr.bf16.mxu0 %v4246_v4 }
 0x35f   : > { %2758 = vmatprep.subr.bf16.mxu1 %v4258_v43 }
 0x361   : > { %2728 = vmatpush3.bf16.msra.mxu0 %v4267_v51 }
 0x362   : > { %2760 = vmatpush3.bf16.msra.mxu1 %v4271_v20 }
 0x364   : > { %1633 = vmatmul.mubr.f32.vlgmr.msra.gmra.mrb[12].mxu0 %v1560_v42 }
 0x365   : > { %1708 = vmatmul.mubr.f32.vlgmr.msra.gmra.mrb[12].mxu1 %v1562_v0  ;;  %1637 = vmatprep.mubr.f32.mxu0 %v1565_v17 }
 0x366   : > { %1712 = vmatprep.mubr.f32.mxu1 %v1567_v10 }
 0x368   : > { %1638 = vmatmul.mubr.f32.gmra.mrb[14].mxu0 %v1564_v49 }
 0x369   : > { %1713 = vmatmul.mubr.f32.gmra.mrb[14].mxu1 %v1566_v6 }
 0x416   : > { %v2437_v29 = vpop.f32.mrb[8].mxu0 }
 0x417   : > { %v2438_v33 = vpop.f32.mrb[9].mxu0 }
 0x418   : > { %v2475_v35 = vpop.f32.mrb[8].mxu1  ;;  %v2439_v11 = vadd.f32 %v2438_v33, %v2437_v29 }
 0x419   : > { %v2476_v9 = vpop.f32.mrb[9].mxu1 }
 0x41a   : > { %v2477_v58 = vadd.f32 %v2476_v9, %v2475_v35 }
 0x41b   : > { %v2440_v59 = vpop.f32.mrb[10].mxu0 }
 0x41c   : > { %v1545_v5 = vadd.f32 %v2477_v58, %v2439_v11  ;;  %v2478_v41 = vpop.f32.mrb[10].mxu1  ;;  %v2441_v52 = vpop.f32.mrb[11].mxu0 }
 0x41d   : > { %v2442_v8 = vadd.f32 %v2441_v52, %v2440_v59  ;;  %v2479_v44 = vpop.f32.mrb[11].mxu1 }
 0x41e   : > { %v1553_v22 = vadd.f32 %v1545_v5, %v1401_v14  ;;  %v2480_v60 = vadd.f32 %v2479_v44, %v2478_v41 }
 0x420   : > { %1556 = vst.msk [vmem:[#allocation3] sm:$0xff] %vm1555_vm11, %v1553_v22  ;;  %v1550_v23 = vadd.f32 %v2480_v60, %v2442_v8 }
 0x422   : > { %v1554_v16 = vadd.f32 %v1550_v23, %v1402_v54 }
 0x424   : > { %1557 = vst.msk [vmem:[#allocation3 + $0x8] sm:$0xff] %vm1555_vm11, %v1554_v16 }
 0x437   : > { %v2513_v28 = vpop.f32.mrb[12].mxu0 }
 0x438   : > { %v2551_v47 = vpop.f32.mrb[12].mxu1  ;;  %v2514_v30 = vpop.f32.mrb[13].mxu0 }
 0x439   : > { %v2515_v39 = vadd.f32 %v2514_v30, %v2513_v28  ;;  %v2552_v13 = vpop.f32.mrb[13].mxu1 }
 0x43a   : > { %v2553_v15 = vadd.f32 %v2552_v13, %v2551_v47 }
 0x43b   : > { %v2516_v38 = vpop.f32.mrb[14].mxu0 }
 0x43c   : > { %v1710_v19 = vadd.f32 %v2553_v15, %v2515_v39  ;;  %v2554_v3 = vpop.f32.mrb[14].mxu1  ;;  %v2517_v56 = vpop.f32.mrb[15].mxu0 }
 0x43d   : > { %v2518_v63 = vadd.f32 %v2517_v56, %v2516_v38  ;;  %v2555_v48 = vpop.f32.mrb[15].mxu1 }
 0x43e   : > { %v1718_v7 = vadd.f32 %v1710_v19, %v1558_v2  ;;  %v2556_v36 = vadd.f32 %v2555_v48, %v2554_v3 }
 0x440   : > { %1720 = vst.msk [vmem:[#allocation4] sm:$0xff] %vm1555_vm11, %v1718_v7  ;;  %v1715_v40 = vadd.f32 %v2556_v36, %v2518_v63 }
 0x442   : > { %v1719_v53 = vadd.f32 %v1715_v40, %v1559_v45 }
 0x444   : > { %1721 = vst.msk [vmem:[#allocation4 + $0x8] sm:$0xff] %vm1555_vm11, %v1719_v53 }
 0x445 PF: > { %p2384_p4 = scmp.ne.s32.totalorder %s3084_s21, 1 }
 0x446   : > { %v1805_v31 = vld [vmem:[%s3254_s28] sm:$0xff] (!%p2384_p4)  ;;  %vm1838_vm12 = vcmask (!%p2384_p4), 1043456   ;;  %v1806_v26 = vld [vmem:[%s3254_s28 + $0x8] sm:$0xff] (!%p2384_p4)  ;;  %v3109_v43 = vmov (!%p2384_p4), 0   ;;  %vm1834_vm13 = vcmask (!%p2384_p4), 64512   ;;  %s2403_s15 = sshll.u32 (!%p2384_p4), %s3080_s20, 6 }
 0x447   : > { %1727 = sbr.rel (%p2384_p4) target bundleno = 1786 (0x6fa), region = 76  ;;  %v2389_v4 = vcombine.high (!%p2384_p4), %v1805_v31, %v1805_v31  ;;  %v2391_v24 = vcombine.high (!%p2384_p4), %v1806_v26, %v1806_v26  ;;  %v2388_v50 = vcombine.low (!%p2384_p4), %v1805_v31, %v1805_v31  ;;  %v2390_v27 = vcombine.low (!%p2384_p4), %v1806_v26, %v1806_v26  ;;  %1883 = vmatprep.mubr.bf16.mxu0 (!%p2384_p4), %v3109_v43  ;;  %v2997_v55 = vld [vmem:[%s4674_s5] sm:$0xff] (!%p2384_p4)   ;;  %v1732_v20 = vld [vmem:[#allocation4] sm:$0xff] (!%p2384_p4)  ;;  %v1729_v32 = vld [vmem:[#allocation3 + $0x8] sm:$0xff] (!%p2384_p4)  ;;  %s1758_s21 = scalar_lea.vmem (!%p2384_p4), [#allocation2], %s2403_s15 }
 0x448   : > { %1926 = vmatprep.mubr.bf16.mxu1 (!%p2384_p4), %v3109_v43  ;;  %2952 = vset.pattern.permute.xlu0 (!%p2384_p4), %v3109_v43  ;;  %v1807_v1 = vld [vmem:[%s4675_s6] sm:$0xff] (!%p2384_p4)  ;;  %v1734_v12 = vmul.f32 (!%p2384_p4), 0.001953125, %v1732_v20  ;;  %v1731_v57 = vmul.f32 (!%p2384_p4), 0.001953125, %v1729_v32  ;;  %v1743_v29 = vld [vmem:[%s4676_s7 + $0x8] sm:$0xff] (!%p2384_p4)  ;;  %v1761_v16 = vld [vmem:[%s1758_s21 + $0x10] sm:$0xff] (!%p2384_p4)  ;;  %s3110_s22 = smov (!%p2384_p4), 127  }
 0x449   : > { %v1728_v51 = vld [vmem:[#allocation3] sm:$0xff] (!%p2384_p4)  ;;  %2392 = vmatprep.subr.msk.bf16.mxu0 (!%p2384_p4), %vm1838_vm12, %v2389_v4  ;;  %2394 = vmatprep.subr.msk.bf16.mxu1 (!%p2384_p4), %vm1838_vm12, %v2391_v24  ;;  %v1840_v34 = vsel (!%p2384_p4), %vm1838_vm12, %v2388_v50, 0  ;;  %v1846_v25 = vsel (!%p2384_p4), %vm1838_vm12, %v2390_v27, 0  ;;  %v1751_v59 = vld [vmem:[%s4677_s8 + $0x8] sm:$0xff] (!%p2384_p4)  ;;  %v1762_v28 = vld [vmem:[%s1758_s21 + $0x18] sm:$0xff] (!%p2384_p4) }
 0x44a   : > { %v1730_v18 = vmul.f32 (!%p2384_p4), 0.001953125, %v1728_v51  ;;  %1852 = vmatpush1.bf16.msra.mxu0 (!%p2384_p4), %v1840_v34  ;;  %1895 = vmatpush1.bf16.msra.mxu1 (!%p2384_p4), %v1846_v25  ;;  %v1737_v37 = vmul.f32 (!%p2384_p4), %v1731_v57, %v1731_v57  ;;  %v1742_v61 = vld [vmem:[%s4676_s7] sm:$0xff] (!%p2384_p4)  ;;  %v1808_v52 = vld [vmem:[%s4675_s6 + $0x8] sm:$0xff] (!%p2384_p4)  ;;  %v1765_v39 = vld [vmem:[%s1758_s21 + $0x30] sm:$0xff] (!%p2384_p4) }
 0x44b   : > { %v1733_v46 = vld [vmem:[#allocation4 + $0x8] sm:$0xff] (!%p2384_p4)  ;;  %2951 = vset.pattern.permute.xlu1 (!%p2384_p4), %v3109_v43  ;;  %v1750_v58 = vld [vmem:[%s4677_s8] sm:$0xff] (!%p2384_p4)  ;;  %v1760_v23 = vld [vmem:[%s1758_s21 + $0x8] sm:$0xff] (!%p2384_p4) }
 0x44c   : > { %v1735_v62 = vmul.f32 (!%p2384_p4), 0.001953125, %v1733_v46  ;;  %v1736_v21 = vmul.f32 (!%p2384_p4), %v1730_v18, %v1730_v18  ;;  %1811 = vperm.xlu1 (!%p2384_p4), %2951, %v1807_v1   ;;  %v1759_v60 = vld [vmem:[%s1758_s21] sm:$0xff] (!%p2384_p4)  ;;  %v1764_v13 = vld [vmem:[%s1758_s21 + $0x28] sm:$0xff] (!%p2384_p4)  ;;  %v1766_v15 = vld [vmem:[%s1758_s21 + $0x38] sm:$0xff] (!%p2384_p4) }
 0x44d   : > { %2393 = vmatmul.mubr.msk.bf16.vlgmr.msra.gmra.mrb[0].mxu0 (!%p2384_p4), %vm1834_vm13, %v2997_v55  ;;  %2395 = vmatmul.mubr.msk.bf16.vlgmr.msra.gmra.mrb[0].mxu1 (!%p2384_p4), %vm1834_vm13, %v2997_v55  ;;  %v1763_v30 = vld [vmem:[%s1758_s21 + $0x20] sm:$0xff] (!%p2384_p4)  ;;  %s3111_s21 = smov (!%p2384_p4), 108  }
 0x44e   : > { %v1738_v42 = vsub.f32 %v1734_v12, %v1736_v21  ;;  %v1739_v0 = vsub.f32 %v1735_v62, %v1737_v37 }
 0x450   : > { %v1740_v17 = vmax.f32 %v1738_v42, 0.0  ;;  %v1741_v10 = vmax.f32 %v1739_v0, 0.0 }
 0x452   : > { %v1744_v49 = vadd.f32 1e-05, %v1740_v17  ;;  %v1745_v6 = vadd.f32 1e-05, %v1741_v10 }
 0x454   : > { %2998 = vrsqrt.f32 %v1744_v49 }
 0x455   : > { %3000 = vrsqrt.f32 %v1745_v6 }
 0x45e   : > { %v2999_v33 = vpop.eup %2998 }
 0x45f   : > { %v3001_v35 = vpop.eup %3000  ;;  %v1748_v11 = vmul.f32 %v2999_v33, %v1742_v61 }
 0x460   : > { %v1749_v9 = vmul.f32 %v3001_v35, %v1743_v29 }
 0x461   : > { %1769 = vperm.xlu0 %2952, %v1748_v11   ;;  %v1752_v14 = vmul.f32 %v1748_v11, %v1730_v18 }
 0x462   : > { %1774 = vperm.xlu1 %2951, %v1749_v9   ;;  %v1753_v5 = vmul.f32 %v1749_v9, %v1731_v57  ;;  %v2029_v9 = vld [vmem:[%s4679_s10 + $0x80] sm:$0xff] }
 0x463   : > { %v1754_v41 = vsub.f32 %v1750_v58, %v1752_v14  ;;  %v2030_v58 = vld [vmem:[%s4679_s10 + $0x88] sm:$0xff]  ;;  %v2061_v14 = vld [vmem:[%s4679_s10 + $0x180] sm:$0xff] }
 0x464   : > { %v1755_v8 = vsub.f32 %v1751_v59, %v1753_v5  ;;  %v2761_v59 = vpack.c.bf16 %v2030_v58, %v2029_v9  ;;  %v2062_v5 = vld [vmem:[%s4679_s10 + $0x188] sm:$0xff] }
 0x465   : > { %1787 = vperm.xlu0 %2952, %v1754_v41   ;;  %v2013_v41 = vld [vmem:[%s4679_s10] sm:$0xff] }
 0x466   : > { %1816 = vperm.xlu1 %2951, %v1808_v52   ;;  %v2793_v52 = vpack.c.bf16 %v2062_v5, %v2061_v14  ;;  %2762 = vmatprep.subr.bf16.mxu0 %v2761_v59  ;;  %v2053_v14 = vld [vmem:[%s4679_s10 + $0x140] sm:$0xff]  ;;  %v2054_v59 = vld [vmem:[%s4679_s10 + $0x148] sm:$0xff]  ;;  %v2039_v5 = vld [vmem:[%s4679_s10 + $0xd0] sm:$0xff] }
 0x468   : > { %2794 = vmatprep.subr.bf16.mxu1 %v2793_v52  ;;  %v2071_v52 = vld [vmem:[%s4679_s10 + $0x1d0] sm:$0xff] }
 0x469   : > { %1792 = vperm.xlu0 %2952, %v1755_v8   ;;  %v2014_v8 = vld [vmem:[%s4679_s10 + $0x8] sm:$0xff] }
 0x4cb   : > { %v1812_v22 = vpop.permute.xlu1 %1811 }
 0x4e0   : > { %v1770_v44 = vpop.permute.xlu0 %1769 }
 0x4e1   : > { %v1775_v47 = vpop.permute.xlu1 %1774  ;;  %v1777_v2 = vmul.f32 %v1770_v44, %v1759_v60  ;;  %v1778_v38 = vmul.f32 %v1770_v44, %v1760_v23  ;;  %v1779_v19 = vmul.f32 %v1770_v44, %v1761_v16  ;;  %v1780_v3 = vmul.f32 %v1770_v44, %v1762_v28  ;;  %v2045_v44 = vld [vmem:[%s4679_s10 + $0x100] sm:$0xff]  ;;  %v2031_v28 = vld [vmem:[%s4679_s10 + $0x90] sm:$0xff] }
 0x4e2   : > { %v1781_v56 = vmul.f32 %v1775_v47, %v1763_v30  ;;  %v1783_v63 = vmul.f32 %v1775_v47, %v1765_v39  ;;  %v1782_v48 = vmul.f32 %v1775_v47, %v1764_v13  ;;  %v1784_v7 = vmul.f32 %v1775_v47, %v1766_v15  ;;  %v2032_v47 = vld [vmem:[%s4679_s10 + $0x98] sm:$0xff]  ;;  %v2063_v30 = vld [vmem:[%s4679_s10 + $0x190] sm:$0xff] }
 0x4e3   : > { %v2763_v23 = vpack.c.bf16 %v2014_v8, %v2013_v41  ;;  %v2765_v39 = vpack.c.bf16 %v2032_v47, %v2031_v28  ;;  %v2064_v13 = vld [vmem:[%s4679_s10 + $0x198] sm:$0xff]  ;;  %v2015_v15 = vld [vmem:[%s4679_s10 + $0x10] sm:$0xff] }
 0x4e4   : > { %v1788_v54 = vpop.permute.xlu0 %1787  ;;  %v2040_v41 = vld [vmem:[%s4679_s10 + $0xd8] sm:$0xff]  ;;  %v2055_v28 = vld [vmem:[%s4679_s10 + $0x150] sm:$0xff] }
 0x4e5   : > { %v1817_v45 = vpop.permute.xlu1 %1816  ;;  %v1795_v40 = vadd.f32 %v1788_v54, %v1777_v2  ;;  %v1797_v31 = vadd.f32 %v1788_v54, %v1779_v19  ;;  %v1796_v4 = vadd.f32 %v1788_v54, %v1778_v38  ;;  %v1798_v24 = vadd.f32 %v1788_v54, %v1780_v3  ;;  %v2016_v2 = vld [vmem:[%s4679_s10 + $0x18] sm:$0xff]  ;;  %v2047_v19 = vld [vmem:[%s4679_s10 + $0x110] sm:$0xff]  ;;  %2764 = vmatpush3.bf16.msra.mxu0 %v2763_v23 }
 0x4e6   : > { %v2797_v38 = vpack.c.bf16 %v2064_v13, %v2063_v30  ;;  %v2048_v3 = vld [vmem:[%s4679_s10 + $0x118] sm:$0xff]  ;;  %2766 = vmatprep.subr.bf16.mxu0 %v2765_v39  ;;  %v2781_v23 = vpack.c.bf16 %v2040_v41, %v2039_v5  ;;  %v2041_v30 = vld [vmem:[%s4679_s10 + $0xe0] sm:$0xff]  ;;  %v2042_v39 = vld [vmem:[%s4679_s10 + $0xe8] sm:$0xff] }
 0x4e7   : > { %v2072_v8 = vld [vmem:[%s4679_s10 + $0x1d8] sm:$0xff]  ;;  %v2073_v13 = vld [vmem:[%s4679_s10 + $0x1e0] sm:$0xff] }
 0x4e8   : > { %v1793_v36 = vpop.permute.xlu0 %1792  ;;  %v2056_v47 = vld [vmem:[%s4679_s10 + $0x158] sm:$0xff] }
 0x4e9   : > { %v1799_v1 = vadd.f32 %v1793_v36, %v1781_v56  ;;  %v1801_v51 = vadd.f32 %v1793_v36, %v1783_v63  ;;  %v1800_v12 = vadd.f32 %v1793_v36, %v1782_v48  ;;  %v1802_v32 = vadd.f32 %v1793_v36, %v1784_v7  ;;  %v2033_v48 = vld [vmem:[%s4679_s10 + $0xa0] sm:$0xff]  ;;  %v2034_v7 = vld [vmem:[%s4679_s10 + $0xa8] sm:$0xff] }
 0x4ea   : > { %v2767_v56 = vpack.c.bf16 %v2016_v2, %v2015_v15  ;;  %v2799_v63 = vpack.c.bf16 %v2048_v3, %v2047_v19  ;;  %v2065_v36 = vld [vmem:[%s4679_s10 + $0x1a0] sm:$0xff]  ;;  %v2074_v15 = vld [vmem:[%s4679_s10 + $0x1e8] sm:$0xff]  ;;  %v2785_v3 = vpack.c.bf16 %v2042_v39, %v2041_v30 }
 0x4eb   : > { %v2025_v19 = vld [vmem:[%s4679_s10 + $0x60] sm:$0xff] }
 0x4ec   : > { %2768 = vmatpush3.bf16.msra.mxu0 %v2767_v56  ;;  %v2817_v56 = vpack.c.bf16 %v2074_v15, %v2073_v13 }
 0x520   : > { %v1885_v53 = vpop.f32.mrb[0].mxu0  ;;  %v1928_v26 = vpop.f32.mrb[0].mxu1 }
 0x521   : > { %v1886_v50 = vadd.f32 %v1885_v53, %v1812_v22  ;;  %v1929_v27 = vadd.f32 %v1928_v26, %v1812_v22  ;;  %v1887_v43 = vpop.f32.mrb[1].mxu0  ;;  %v1930_v55 = vpop.f32.mrb[1].mxu1  ;;  %v2017_v53 = vld [vmem:[%s4679_s10 + $0x20] sm:$0xff] }
 0x522   : > { %v1888_v20 = vadd.f32 %v1887_v43, %v1812_v22  ;;  %v1931_v34 = vadd.f32 %v1930_v55, %v1812_v22  ;;  %v1889_v25 = vpop.f32.mrb[2].mxu0  ;;  %v1932_v18 = vpop.f32.mrb[2].mxu1  ;;  %v2046_v22 = vld [vmem:[%s4679_s10 + $0x108] sm:$0xff]  ;;  %v2067_v43 = vld [vmem:[%s4679_s10 + $0x1b0] sm:$0xff]  ;;  %v2068_v55 = vld [vmem:[%s4679_s10 + $0x1b8] sm:$0xff] }
 0x523   : > { %v4344_v46 = vadd.f32 %v1886_v50, %v1795_v40  ;;  %v4346_v57 = vadd.f32 %v1929_v27, %v1797_v31  ;;  %v1890_v62 = vadd.f32 %v1889_v25, %v1817_v45  ;;  %v1933_v21 = vadd.f32 %v1932_v18, %v1817_v45  ;;  %v1891_v37 = vpop.f32.mrb[3].mxu0  ;;  %v1934_v42 = vpop.f32.mrb[3].mxu1  ;;  %v2066_v40 = vld [vmem:[%s4679_s10 + $0x1a8] sm:$0xff]  ;;  %v2035_v50 = vld [vmem:[%s4679_s10 + $0xb0] sm:$0xff]  ;;  %v2036_v27 = vld [vmem:[%s4679_s10 + $0xb8] sm:$0xff] }
 0x524   : > { %v4348_v0 = vadd.f32 %v1888_v20, %v1796_v4  ;;  %v4350_v17 = vadd.f32 %v1931_v34, %v1798_v24  ;;  %v1892_v10 = vadd.f32 %v1891_v37, %v1817_v45  ;;  %v1935_v49 = vadd.f32 %v1934_v42, %v1817_v45  ;;  %v2018_v31 = vld [vmem:[%s4679_s10 + $0x28] sm:$0xff]  ;;  %v2049_v4 = vld [vmem:[%s4679_s10 + $0x120] sm:$0xff]  ;;  %v2019_v20 = vld [vmem:[%s4679_s10 + $0x30] sm:$0xff] }
 0x525   : > { %v4352_v6 = vadd.f32 %v1890_v62, %v1799_v1  ;;  %v4354_v61 = vadd.f32 %v1933_v21, %v1801_v51  ;;  %v2795_v16 = vpack.c.bf16 %v2046_v22, %v2045_v44  ;;  %v2769_v45 = vpack.c.bf16 %v2034_v7, %v2033_v48  ;;  %v2050_v24 = vld [vmem:[%s4679_s10 + $0x128] sm:$0xff]  ;;  %v2020_v34 = vld [vmem:[%s4679_s10 + $0x38] sm:$0xff]  ;;  %v2037_v62 = vld [vmem:[%s4679_s10 + $0xc0] sm:$0xff] }
 0x526   : > { %v4356_v29 = vadd.f32 %v1892_v10, %v1800_v12  ;;  %v4358_v33 = vadd.f32 %v1935_v49, %v1802_v32  ;;  %v2958_v35 = vpack.i.bf16 %v4350_v17, %v4346_v57  ;;  %v2953_v11 = vpack.i.bf16 %v4348_v0, %v4344_v46  ;;  %v2051_v12 = vld [vmem:[%s4679_s10 + $0x130] sm:$0xff]  ;;  %v2052_v32 = vld [vmem:[%s4679_s10 + $0x138] sm:$0xff]  ;;  %v2038_v21 = vld [vmem:[%s4679_s10 + $0xc8] sm:$0xff] }
 0x527   : > { %2796 = vmatpush3.bf16.msra.mxu1 %v2795_v16  ;;  %v2801_v26 = vpack.c.bf16 %v2066_v40, %v2065_v36  ;;  %v2771_v1 = vpack.c.bf16 %v2018_v31, %v2017_v53  ;;  %v2803_v51 = vpack.c.bf16 %v2050_v24, %v2049_v4  ;;  %2770 = vmatprep.subr.bf16.mxu0 %v2769_v45  ;;  %v2069_v37 = vld [vmem:[%s4679_s10 + $0x1c0] sm:$0xff]  ;;  %v2070_v42 = vld [vmem:[%s4679_s10 + $0x1c8] sm:$0xff]  ;;  %v1961_v40 = vlaneseq  ;;  %v2043_v53 = vld [vmem:[%s4679_s10 + $0xf0] sm:$0xff] }
 0x528   : > { %2959 = vrot.lane.b32.xlu1 %v2958_v35, %s3110_s22  ;;  %2954 = vrot.lane.b32.xlu0 %v2953_v11, %s3110_s22  ;;  %v2968_v60 = vpack.i.bf16 %v4358_v33, %v4354_v61  ;;  %v2963_v54 = vpack.i.bf16 %v4356_v29, %v4352_v6  ;;  %v2773_v25 = vpack.c.bf16 %v2036_v27, %v2035_v50  ;;  %v2021_v35 = vld [vmem:[%s4679_s10 + $0x40] sm:$0xff]  ;;  %v2022_v11 = vld [vmem:[%s4679_s10 + $0x48] sm:$0xff] }
 0x529   : > { %2798 = vmatprep.subr.bf16.mxu1 %v2797_v38  ;;  %v2805_v18 = vpack.c.bf16 %v2068_v55, %v2067_v43  ;;  %2772 = vmatpush3.bf16.msra.mxu0 %v2771_v1  ;;  %v2775_v10 = vpack.c.bf16 %v2020_v34, %v2019_v20  ;;  %v2807_v49 = vpack.c.bf16 %v2052_v32, %v2051_v12  ;;  %v2057_v48 = vld [vmem:[%s4679_s10 + $0x160] sm:$0xff]  ;;  %v2058_v7 = vld [vmem:[%s4679_s10 + $0x168] sm:$0xff]  ;;  %v2044_v31 = vld [vmem:[%s4679_s10 + $0xf8] sm:$0xff]  ;;  %v4545_v4 = vand.u32 127, %v1961_v40 }
 0x52a   : > { %2774 = vmatprep.subr.bf16.mxu0 %v2773_v25  ;;  %v2777_v9 = vpack.c.bf16 %v2038_v21, %v2037_v62  ;;  %v2809_v58 = vpack.c.bf16 %v2070_v42, %v2069_v37  ;;  %v2779_v44 = vpack.c.bf16 %v2022_v11, %v2021_v35  ;;  %v2811_v22 = vpack.c.bf16 %v2054_v59, %v2053_v14  ;;  %v2076_v50 = vld [vmem:[%s4679_s10 + $0x1f8] sm:$0xff]  ;;  %v2027_v27 = vld [vmem:[%s4679_s10 + $0x70] sm:$0xff] }
 0x52b   : > { %2800 = vmatpush3.bf16.msra.mxu1 %v2799_v63  ;;  %v2813_v16 = vpack.c.bf16 %v2072_v8, %v2071_v52  ;;  %v2815_v38 = vpack.c.bf16 %v2056_v47, %v2055_v28  ;;  %v2026_v63 = vld [vmem:[%s4679_s10 + $0x68] sm:$0xff]  ;;  %v2819_v45 = vpack.c.bf16 %v2058_v7, %v2057_v48  ;;  %v2789_v24 = vpack.c.bf16 %v2044_v31, %v2043_v53  ;;  %v2028_v43 = vld [vmem:[%s4679_s10 + $0x78] sm:$0xff] }
 0x52c   : > { %2969 = vrot.lane.b32.xlu1 %v2968_v60, %s3110_s22  ;;  %2964 = vrot.lane.b32.xlu0 %v2963_v54, %s3110_s22  ;;  %v2023_v60 = vld [vmem:[%s4679_s10 + $0x50] sm:$0xff]  ;;  %v2024_v54 = vld [vmem:[%s4679_s10 + $0x58] sm:$0xff]  ;;  %v2787_v36 = vpack.c.bf16 %v2026_v63, %v2025_v19  ;;  %v2791_v1 = vpack.c.bf16 %v2028_v43, %v2027_v27  ;;  %vm1963_vm14 = vcmp.lt.s32.totalorder %v4545_v4, 127  ;;  %vm1996_vm15 = vcmp.lt.s32.totalorder %v4545_v4, 108 }
 0x52d   : > { %2802 = vmatprep.subr.bf16.mxu1 %v2801_v26  ;;  %2776 = vmatpush3.bf16.msra.mxu0 %v2775_v10  ;;  %v2783_v2 = vpack.c.bf16 %v2024_v54, %v2023_v60  ;;  %v2075_v26 = vld [vmem:[%s4679_s10 + $0x1f0] sm:$0xff]  ;;  %v2060_v20 = vld [vmem:[%s4679_s10 + $0x178] sm:$0xff] }
 0x52e   : > { %2778 = vmatprep.subr.bf16.mxu0 %v2777_v9  ;;  %v2821_v55 = vpack.c.bf16 %v2076_v50, %v2075_v26 }
 0x52f   : > { %2804 = vmatpush3.bf16.msra.mxu1 %v2803_v51  ;;  %v2059_v51 = vld [vmem:[%s4679_s10 + $0x170] sm:$0xff] }
 0x530   : > { %2806 = vmatprep.subr.bf16.mxu1 %v2805_v18  ;;  %v2823_v34 = vpack.c.bf16 %v2060_v20, %v2059_v51 }
 0x531   : > { %2780 = vmatpush3.bf16.msra.mxu0 %v2779_v44 }
 0x532   : > { %2782 = vmatprep.subr.bf16.mxu0 %v2781_v23 }
 0x533   : > { %2808 = vmatpush3.bf16.msra.mxu1 %v2807_v49 }
 0x534   : > { %2810 = vmatprep.subr.bf16.mxu1 %v2809_v58 }
 0x535   : > { %2784 = vmatpush3.bf16.msra.mxu0 %v2783_v2 }
 0x536   : > { %2786 = vmatprep.subr.bf16.mxu0 %v2785_v3 }
 0x537   : > { %2812 = vmatpush3.bf16.msra.mxu1 %v2811_v22 }
 0x538   : > { %2814 = vmatprep.subr.bf16.mxu1 %v2813_v16 }
 0x539   : > { %2788 = vmatpush3.bf16.msra.mxu0 %v2787_v36 }
 0x53a   : > { %2790 = vmatprep.subr.bf16.mxu0 %v2789_v24 }
 0x53b   : > { %2816 = vmatpush3.bf16.msra.mxu1 %v2815_v38 }
 0x53c   : > { %2818 = vmatprep.subr.bf16.mxu1 %v2817_v56 }
 0x53d   : > { %2792 = vmatpush3.bf16.msra.mxu0 %v2791_v1 }
 0x53f   : > { %2820 = vmatpush3.bf16.msra.mxu1 %v2819_v45 }
 0x540   : > { %2822 = vmatprep.subr.bf16.mxu1 %v2821_v55 }
 0x543   : > { %2824 = vmatpush3.bf16.msra.mxu1 %v2823_v34 }
 0x59a   : > { %v2960_v25 = vpop.permute.xlu1 %2959  ;;  %v2955_v18 = vpop.permute.xlu0 %2954 }
 0x59b   : > { %v2962_v12 = vunpack.i.h.bf16 %v2960_v25  ;;  %v2961_v32 = vunpack.i.l.bf16 %v2960_v25  ;;  %v2957_v62 = vunpack.i.h.bf16 %v2955_v18  ;;  %v2956_v21 = vunpack.i.l.bf16 %v2955_v18 }
 0x59d   : > { %v1964_v37 = vsel %vm1963_vm14, %v2961_v32, %v2962_v12  ;;  %v1966_v42 = vsel %vm1963_vm14, %v2957_v62, %v2961_v32  ;;  %v1968_v10 = vsel %vm1963_vm14, %v2956_v21, %v2957_v62  ;;  %v1970_v49 = vsel %vm1963_vm14, %v2962_v12, %v2956_v21 }
 0x59e   : > { %v2970_v35 = vpop.permute.xlu1 %2969  ;;  %v2965_v11 = vpop.permute.xlu0 %2964  ;;  %v1974_v9 = vmax.f32 %v4346_v57, %v1964_v37  ;;  %v1975_v58 = vmax.f32 %v4350_v17, %v1970_v49  ;;  %v1972_v14 = vmax.f32 %v4344_v46, %v1968_v10  ;;  %v1973_v59 = vmax.f32 %v4348_v0, %v1966_v42 }
 0x59f   : > { %v2972_v5 = vunpack.i.h.bf16 %v2970_v35  ;;  %v2971_v41 = vunpack.i.l.bf16 %v2970_v35  ;;  %v2967_v52 = vunpack.i.h.bf16 %v2965_v11  ;;  %v2966_v8 = vunpack.i.l.bf16 %v2965_v11 }
 0x5a0   : > { %v2978_v44 = vpack.i.bf16 %v1975_v58, %v1974_v9  ;;  %v2973_v22 = vpack.i.bf16 %v1973_v59, %v1972_v14 }
 0x5a1   : > { %v1965_v60 = vsel %vm1963_vm14, %v2971_v41, %v2972_v5  ;;  %v1967_v54 = vsel %vm1963_vm14, %v2967_v52, %v2971_v41  ;;  %v1969_v57 = vsel %vm1963_vm14, %v2966_v8, %v2967_v52  ;;  %v1971_v46 = vsel %vm1963_vm14, %v2972_v5, %v2966_v8 }
 0x5a2   : > { %2979 = vrot.lane.b32.xlu1 %v2978_v44, %s3111_s21  ;;  %2974 = vrot.lane.b32.xlu0 %v2973_v22, %s3111_s21  ;;  %v1978_v0 = vmax.f32 %v4354_v61, %v1965_v60  ;;  %v1979_v17 = vmax.f32 %v4358_v33, %v1971_v46  ;;  %v1976_v23 = vmax.f32 %v4352_v6, %v1969_v57 }
 0x5a3   : > { %v1977_v16 = vmax.f32 %v4356_v29, %v1967_v54 }
 0x5a4   : > { %v2988_v28 = vpack.i.bf16 %v1979_v17, %v1978_v0 }
 0x5a5   : > { %v2983_v47 = vpack.i.bf16 %v1977_v16, %v1976_v23 }
 0x5a6   : > { %2989 = vrot.lane.b32.xlu1 %v2988_v28, %s3111_s21 }
 0x5a7   : > { %2984 = vrot.lane.b32.xlu0 %v2983_v47, %s3111_s21 }
 0x614   : > { %v2980_v30 = vpop.permute.xlu1 %2979  ;;  %v2975_v39 = vpop.permute.xlu0 %2974 }
 0x615   : > { %v2982_v13 = vunpack.i.h.bf16 %v2980_v30  ;;  %v2981_v15 = vunpack.i.l.bf16 %v2980_v30  ;;  %v2977_v2 = vunpack.i.h.bf16 %v2975_v39  ;;  %v2976_v38 = vunpack.i.l.bf16 %v2975_v39 }
 0x617   : > { %v1997_v61 = vsel %vm1996_vm15, %v2981_v15, %v2982_v13  ;;  %v2001_v6 = vsel %vm1996_vm15, %v2976_v38, %v2977_v2  ;;  %v1999_v29 = vsel %vm1996_vm15, %v2977_v2, %v2981_v15  ;;  %v2003_v33 = vsel %vm1996_vm15, %v2982_v13, %v2976_v38 }
 0x618   : > { %v2007_v19 = vmax.f32 %v1974_v9, %v1997_v61  ;;  %v2005_v3 = vmax.f32 %v1972_v14, %v2001_v6  ;;  %v2990_v56 = vpop.permute.xlu1 %2989  ;;  %v2006_v63 = vmax.f32 %v1973_v59, %v1999_v29  ;;  %v2008_v48 = vmax.f32 %v1975_v58, %v2003_v33 }
 0x619   : > { %v2992_v7 = vunpack.i.h.bf16 %v2990_v56  ;;  %v2991_v36 = vunpack.i.l.bf16 %v2990_v56  ;;  %v2985_v45 = vpop.permute.xlu0 %2984 }
 0x61a   : > { %v2987_v40 = vunpack.i.h.bf16 %v2985_v45  ;;  %v2986_v53 = vunpack.i.l.bf16 %v2985_v45  ;;  %2141 = vmatprep.mubr.f32.mxu0 %v2006_v63  ;;  %2216 = vmatprep.mubr.f32.mxu1 %v2008_v48 }
 0x61b   : > { %2142 = vmatmul.mubr.f32.vlgmr.msra.gmra.mrb[4].mxu0 %v2005_v3  ;;  %2217 = vmatmul.mubr.f32.vlgmr.msra.gmra.mrb[4].mxu1 %v2007_v19  ;;  %v1998_v31 = vsel %vm1996_vm15, %v2991_v36, %v2992_v7 }
 0x61c   : > { %v2000_v26 = vsel %vm1996_vm15, %v2987_v40, %v2991_v36  ;;  %v2004_v24 = vsel %vm1996_vm15, %v2992_v7, %v2986_v53  ;;  %v2002_v50 = vsel %vm1996_vm15, %v2986_v53, %v2987_v40  ;;  %v2011_v27 = vmax.f32 %v1978_v0, %v1998_v31 }
 0x61d   : > { %v2010_v43 = vmax.f32 %v1977_v16, %v2000_v26  ;;  %v2012_v55 = vmax.f32 %v1979_v17, %v2004_v24  ;;  %v2009_v1 = vmax.f32 %v1976_v23, %v2002_v50 }
 0x61f   : > { %2146 = vmatprep.mubr.f32.mxu0 %v2010_v43  ;;  %2221 = vmatprep.mubr.f32.mxu1 %v2012_v55 }
 0x620   : > { %2147 = vmatmul.mubr.f32.gmra.mrb[6].mxu0 %v2009_v1  ;;  %2222 = vmatmul.mubr.f32.gmra.mrb[6].mxu1 %v2011_v27 }
 0x6ee   : > { %v2589_v51 = vpop.f32.mrb[4].mxu0  ;;  %v2627_v20 = vpop.f32.mrb[4].mxu1 }
 0x6ef   : > { %v2590_v34 = vpop.f32.mrb[5].mxu0  ;;  %v2628_v25 = vpop.f32.mrb[5].mxu1 }
 0x6f0   : > { %v2591_v18 = vadd.f32 %v2590_v34, %v2589_v51  ;;  %v2629_v12 = vadd.f32 %v2628_v25, %v2627_v20 }
 0x6f2   : > { %v2219_v32 = vadd.f32 %v2629_v12, %v2591_v18 }
 0x6f3   : > { %v2592_v62 = vpop.f32.mrb[6].mxu0  ;;  %v2630_v4 = vpop.f32.mrb[6].mxu1 }
 0x6f4   : > { %2227 = vst [vmem:[%s3256_s27] sm:$0xff] %v2219_v32  ;;  %v2593_v21 = vpop.f32.mrb[7].mxu0  ;;  %v2631_v37 = vpop.f32.mrb[7].mxu1 }
 0x6f5   : > { %v2594_v42 = vadd.f32 %v2593_v21, %v2592_v62  ;;  %v2632_v10 = vadd.f32 %v2631_v37, %v2630_v4 }
 0x6f7   : > { %v2224_v49 = vadd.f32 %v2632_v10, %v2594_v42 }
 0x6f9   : > { %2228 = vst [vmem:[%s3256_s27 + $0x8] sm:$0xff] %v2224_v49 }
 0x6fa PF: > { %s2404_s28 = sshll.u32 %s3080_s20, 8  ;;  %s2243_s25 = sshll.u32 %s3256_s27, 4  ;;  %s4613_s25 = int_to_ptr.vmem [resolvable:$true] %s2243_s25 }
 0x6fb   : > { %s4610_s22 = scalar_lea.hbm %s4680_s11, %s2404_s28  ;;  %s4762_s26 = sand.u32 1, %s3072_s18  }
 0x6fc   : > { %s4617_s29 = scalar_lea.sflag [#allocation6], %s4762_s26  ;;  %s3002_s23 = scalar_lea.vmem %s4613_s25, 256 }
 0x6fd   : > { %p3003_p5 = scmp.ne.s32.totalorder %s4613_s25, %s3002_s23  ;;  %s3112_s20 = smov [#allocation5]  }
 0x6fe   : > { %s3006_s30 = sshll.u32 %s3112_s20, 4  ;;  %s3007_s30 = int_to_ptr.vmem [resolvable:$false] %s3006_s30 }
 0x6ff   : > { %p3004_p6 = pnand %p3003_p5, %p3227_p3  ;;  %s3008_s0 = scalar_lea.vmem %s3007_s30, 512 }
 0x700   : > { %p3009_p9 = scmp.lt.s32.totalorder %s4613_s25, %s3007_s30  ;;  %p3010_p10 = scmp.lt.s32.totalorder %s3008_s0, %s3002_s23 }
 0x701   : > { %p3005_p7 = pneg %p3004_p6 }
 0x702   : > { %p3011_p11 = por %p3010_p10, %p3009_p9 }
 0x704   : > { %p3012_p12 = pnand %p3011_p11, %p3005_p7 }
 0x706   : > { %3015 = shalt.err (!%p3012_p12)
}
 0x707   : > { %s3016_s27 = scalar_lea.hbm %s4610_s22, 256  ;;  %s3020_s28 = scalar_lea.hbm %s4680_s11, 512 }
 0x708   : > { %p3017_p13 = scmp.ne.s32.totalorder %s4610_s22, %s3016_s27  ;;  %p3021_p2 = scmp.lt.u32.totalorder %s4610_s22, %s4680_s11 }
 0x709   : > { %p3022_p4 = scmp.lt.u32.totalorder %s3020_s28, %s3016_s27  ;;  %p3024_p6 = scmp.lt.u32.totalorder %s3016_s27, %s4610_s22 }
 0x70a   : > { %p3018_p0 = pnand %p3017_p13, %p3227_p3 }
 0x70b   : > { %p3023_p5 = por %p3022_p4, %p3021_p2 }
 0x70c   : > { %p3019_p1 = pneg %p3018_p0 }
 0x70d   : > { %p3025_p7 = por %p3024_p6, %p3023_p5 }
 0x70f   : > { %p3026_p9 = pnand %p3025_p7, %p3019_p1 }
 0x711   : > { %3029 = shalt.err (!%p3026_p9)
}
 0x712   : > { %s3113_s26 = smov 128   ;;  %s3114_s23 = smov 8  }
 0x713   : > { %2825 = dma.vmem_to_hbm [thread:$0]  (%p3227_p3), %s4613_s25, 256, %s4610_s22, %s4617_s29, %s3113_s26, %s3113_s26, %s3114_s23  }
 0x714 PF: > { %p2831_p10 = scmp.ge.s32.totalorder %s3096_s24, 2  ;;  %s2258_s20 = sand.u32 1, %s3068_s17  }
 0x715   : > { %s2259_s30 = scalar_lea.sflag [#allocation6], %s2258_s20 }
 0x716   : > { %p2828_p11 = pnand %p2831_p10, %p3238_p8 }
 0x718   : > { %3063 = dma.done.wait (!%p2828_p11), %s2259_s30, 256  }
 0x719   : > { %3065 = vsyncadd (!%p2828_p11), %s2259_s30, 4294967040  ;;  %s24_s24 = sadd.s32 1, %s3096_s24   ;;  %s4763_s20 = sld [smem:[#allocation8_spill]] }
 0x71a   : > { %p21_p12 = scmp.ge.s32.totalorder %s24_s24, 6   ;;  %s4764_s21 = sld [smem:[#allocation9_spill]] }
 0x71b   : > { %s4765_s22 = sld [smem:[#allocation10_spill]]  ;;  %s4766_s23 = sld [smem:[#allocation11_spill]] }
 0x71c   : > { %s4767_s17 = smov %s3072_s18  ;;  %s4768_s18 = smov %s3076_s19 }
 0x71d   : > { %s4769_s19 = smov %s3236_s13  ;;  %23 = sbr.rel (!%p21_p12) target bundleno = 8 (0x8), region = 145 }
 0x724   :  { %2264 = vsyncpa [#allocation6], 1 }
 0x725   :  { %2266 = vsyncpa [#allocation6 + $0x1], 1 }

</bundles_post_ra>
